<compile_context>
chip_gen: v6e
topology: v6e:2x2x1
jax: 0.10.0
libtpu: 0.0.40
codegen_flags: <defaults>
</compile_context>

<pallas_src>
import math

import numpy as np
import jax
import jax.numpy as jnp
from jax.experimental import pallas as pl
from jax.experimental.pallas import tpu as pltpu

# ---- model config (matches the module's defaults) ----
INPUT_SIZE = 8                    # input_size
NON_EXP = 5                       # non_expansion_size
FEATURE_SIZE = 16                 # feature_size == d_model (divisible by nhead)
OUTPUT_SIZE = 1                   # output_size (so .squeeze(2) -> (B, S))
NHEAD = 2
NUM_LAYERS = 2
HEAD_DIM = FEATURE_SIZE // NHEAD
D_FF = 2048                       # nn.TransformerEncoderLayer default dim_feedforward
D_IN = INPUT_SIZE + NON_EXP       # raw input channel count = 13
EXPAND = FEATURE_SIZE - NON_EXP   # feature_expander output width = 11
EPS = 1e-5                        # LayerNorm eps (PyTorch default)
NEG_BIG = -1e30                   # additive "-inf" for the block-diagonal mask


def _layer_norm(x, w, b):
    mu = jnp.mean(x, axis=-1, keepdims=True)
    var = jnp.mean((x - mu) ** 2, axis=-1, keepdims=True)
    return (x - mu) * jax.lax.rsqrt(var + EPS) * w + b


# ---------------- one-time weight plumbing (hoisted out of the call path) ------
def prepare_params(p):
    d = FEATURE_SIZE
    scale = 1.0 / math.sqrt(HEAD_DIM)

    # feature expander weights padded to d_model columns; passthrough columns are
    # exact zeros (the passthrough itself is added as a separate VPU operand).
    w_exp = jnp.zeros((D_IN, d), jnp.float32)
    w_exp = w_exp.at[:INPUT_SIZE, :EXPAND].set(p["exp_w"].T)
    b_exp = jnp.concatenate([p["exp_b"], jnp.zeros((NON_EXP,), jnp.float32)])[None, :]

    in_w, in_b = p["in_w"], p["in_b"]            # (L, 3d, d) / (L, 3d), (out, in)
    wq = jnp.swapaxes(in_w[:, :d, :], 1, 2) * scale        # scale folded into q proj
    wk = jnp.swapaxes(in_w[:, d:2 * d, :], 1, 2)
    wv = jnp.swapaxes(in_w[:, 2 * d:, :], 1, 2)
    bq = (in_b[:, :d] * scale)[:, None, :]
    bk = in_b[:, d:2 * d][:, None, :]
    bv = in_b[:, 2 * d:][:, None, :]

    wo = jnp.swapaxes(p["out_w"], 1, 2)          # (L, d_in, d_out)
    bo = p["out_b"][:, None, :]

    # FF weights: natural (K, N) layouts, bf16 to halve HBM traffic.
    w1 = jnp.swapaxes(p["ff_w1"], 1, 2).astype(jnp.bfloat16)   # (L, d, D_FF)
    w2 = jnp.swapaxes(p["ff_w2"], 1, 2).astype(jnp.bfloat16)   # (L, D_FF, d)
    b1 = p["ff_b1"][:, None, :]
    b2 = p["ff_b2"][:, None, :]

    head_mask = np.zeros((NHEAD, 1, d), np.float32)
    for hh in range(NHEAD):
        head_mask[hh, 0, hh * HEAD_DIM:(hh + 1) * HEAD_DIM] = 1.0

    return dict(
        w_exp=w_exp, b_exp=b_exp,
        wq=wq, bq=bq, wk=wk, bk=bk, wv=wv, bv=bv, wo=wo, bo=bo,
        ln1_w=p["ln1_w"][:, None, :], ln1_b=p["ln1_b"][:, None, :],
        ln2_w=p["ln2_w"][:, None, :], ln2_b=p["ln2_b"][:, None, :],
        w1=w1, b1=b1, w2=w2, b2=b2,
        dec_w=p["dec_w"], dec_b=p["dec_b"][:, None],
        head_mask=jnp.asarray(head_mask),
    )


# ---------------- Pallas forward -----------------------------------------------
def forward_pallas(x, w):
    B, S, _ = x.shape
    BS = B * S

    x2d = x.reshape(BS, D_IN)
    # exact passthrough of the non-expanded features, placed at columns EXPAND:
    x_pass = jnp.pad(x[:, :, INPUT_SIZE:].reshape(BS, NON_EXP),
                     ((0, 0), (EXPAND, 0)))

    # additive batch-block-diagonal mask (trace-time numpy constant)
    tok_batch = np.arange(BS) // S
    mask_bias = jnp.asarray(
        np.where(tok_batch[:, None] == tok_batch[None, :], 0.0, NEG_BIG)
        .astype(np.float32))

    const_in = [x2d, w["w_exp"], w["b_exp"], x_pass, mask_bias, w["head_mask"],
                w["dec_w"], w["dec_b"]]
    layer_in = [w["wq"], w["bq"], w["wk"], w["bk"], w["wv"], w["bv"],
                w["wo"], w["bo"], w["ln1_w"], w["ln1_b"], w["ln2_w"], w["ln2_b"],
                w["w1"], w["b1"], w["w2"], w["b2"]]

    def _const_spec(a):
        nd = a.ndim
        return pl.BlockSpec(a.shape, lambda l, _nd=nd: (0,) * _nd)

    def _layer_spec(a):
        nz = a.ndim - 1
        return pl.BlockSpec((1,) + a.shape[1:],
                            lambda l, _nz=nz: (l,) + (0,) * _nz)

    in_specs = [_const_spec(a) for a in const_in] + [_layer_spec(a) for a in layer_in]

    def kernel(x_ref, wexp_ref, bexp_ref, xpass_ref, maskb_ref, hmask_ref,
               decw_ref, decb_ref,
               wq_ref, bq_ref, wk_ref, bk_ref, wv_ref, bv_ref,
               wo_ref, bo_ref, ln1w_ref, ln1b_ref, ln2w_ref, ln2b_ref,
               w1_ref, b1_ref, w2_ref, b2_ref,
               o_ref, h_ref):
        l = pl.program_id(0)

        # ---- layer 0: fused feature expander + exact passthrough add ----
        @pl.when(l == 0)
        def _():
            h_ref[...] = (jnp.dot(x_ref[...], wexp_ref[...],
                                  preferred_element_type=jnp.float32)
                          + bexp_ref[...] + xpass_ref[...])

        h = h_ref[...]

        # ---- self-attention (post-norm encoder layer) ----
        q = jnp.dot(h, wq_ref[0], preferred_element_type=jnp.float32) + bq_ref[0]
        k = jnp.dot(h, wk_ref[0], preferred_element_type=jnp.float32) + bk_ref[0]
        v = jnp.dot(h, wv_ref[0], preferred_element_type=jnp.float32) + bv_ref[0]

        ctx = None
        for hh in range(NHEAD):                      # static unroll, NHEAD=2
            m = hmask_ref[hh]                        # (1, d) lane mask for this head
            s = jax.lax.dot_general(q * m, k, (((1,), (1,)), ((), ())),
                                    preferred_element_type=jnp.float32)
            s = s + maskb_ref[...]
            s = s - jnp.max(s, axis=-1, keepdims=True)
            e = jnp.exp(s)
            pa = e / jnp.sum(e, axis=-1, keepdims=True)      # exact divide
            c = jnp.dot(pa, v * m, preferred_element_type=jnp.float32)
            ctx = c if ctx is None else ctx + c

        attn = jnp.dot(ctx, wo_ref[0], preferred_element_type=jnp.float32) + bo_ref[0]
        h = _layer_norm(h + attn, ln1w_ref[0], ln1b_ref[0])

        # ---- feed-forward (bf16 weights / inputs, f32 accumulation) ----
        ff = jnp.dot(h.astype(jnp.bfloat16), w1_ref[0],
                     preferred_element_type=jnp.float32) + b1_ref[0]
        ff = jnp.maximum(ff, 0.0)                    # ReLU (PyTorch default)
        ff = jnp.dot(ff.astype(jnp.bfloat16), w2_ref[0],
                     preferred_element_type=jnp.float32) + b2_ref[0]
        h = _layer_norm(h + ff, ln2w_ref[0], ln2b_ref[0])

        h_ref[...] = h                               # carry to next layer

        # ---- decoder projection, lane-dense (1, BS) output ----
        @pl.when(l == pl.num_programs(0) - 1)
        def _():
            o_ref[...] = (jax.lax.dot_general(
                decw_ref[...], h, (((1,), (1,)), ((), ())),
                preferred_element_type=jnp.float32) + decb_ref[...])

    out = pl.pallas_call(
        kernel,
        out_shape=jax.ShapeDtypeStruct((1, BS), jnp.float32),
        grid_spec=pltpu.PrefetchScalarGridSpec(
            num_scalar_prefetch=0,
            grid=(NUM_LAYERS,),
            in_specs=in_specs,
            out_specs=pl.BlockSpec((1, BS), lambda l: (0, 0)),
            scratch_shapes=[pltpu.VMEM((BS, FEATURE_SIZE), jnp.float32)]),
        compiler_params=pltpu.CompilerParams(
            dimension_semantics=("arbitrary",)),
    )(*(const_in + layer_in))
    return out.reshape(B, S)                         # decoder output .squeeze(2)


# ---------------- pure-JAX reference (same math, for verification) -------------
def forward_reference(x, p):
    B, S, _ = x.shape
    h = jnp.concatenate(
        [jnp.einsum("bsi,oi->bso", x[:, :, :INPUT_SIZE], p["exp_w"]) + p["exp_b"],
         x[:, :, INPUT_SIZE:]], axis=-1)
    for l in range(NUM_LAYERS):
        qkv = jnp.einsum("bsd,od->bso", h, p["in_w"][l]) + p["in_b"][l]
        q, k, v = jnp.split(qkv, 3, axis=-1)

        def split_heads(t):
            return t.reshape(B, S, NHEAD, HEAD_DIM).transpose(0, 2, 1, 3)

        qh, kh, vh = split_heads(q), split_heads(k), split_heads(v)
        s = jnp.einsum("bhqd,bhkd->bhqk", qh, kh) / math.sqrt(HEAD_DIM)
        a = jax.nn.softmax(s, axis=-1)
        o = jnp.einsum("bhqk,bhkd->bhqd", a, vh)
        o = o.transpose(0, 2, 1, 3).reshape(B, S, FEATURE_SIZE)
        o = jnp.einsum("bsd,od->bso", o, p["out_w"][l]) + p["out_b"][l]
        h = _layer_norm(h + o, p["ln1_w"][l], p["ln1_b"][l])
        ff = jax.nn.relu(jnp.einsum("bsd,fd->bsf", h, p["ff_w1"][l]) + p["ff_b1"][l])
        ff = jnp.einsum("bsf,df->bsd", ff, p["ff_w2"][l]) + p["ff_b2"][l]
        h = _layer_norm(h + ff, p["ln2_w"][l], p["ln2_b"][l])
    out = jnp.einsum("bsd,od->bso", h, p["dec_w"]) + p["dec_b"]
    return out[:, :, 0]


# ---------------- deterministic parameter init ---------------------------------
def init_params(key):
    ks = jax.random.split(key, 16)

    def rn(k, shape, scale):
        return jax.random.normal(k, shape, jnp.float32) * scale

    return {
        "exp_w": rn(ks[0], (EXPAND, INPUT_SIZE), 0.2),
        "exp_b": rn(ks[1], (EXPAND,), 0.1),
        "in_w":  rn(ks[2], (NUM_LAYERS, 3 * FEATURE_SIZE, FEATURE_SIZE), 0.2),
        "in_b":  rn(ks[3], (NUM_LAYERS, 3 * FEATURE_SIZE), 0.05),
        "out_w": rn(ks[4], (NUM_LAYERS, FEATURE_SIZE, FEATURE_SIZE), 0.2),
        "out_b": rn(ks[5], (NUM_LAYERS, FEATURE_SIZE), 0.05),
        "ln1_w": 1.0 + rn(ks[6], (NUM_LAYERS, FEATURE_SIZE), 0.02),
        "ln1_b": rn(ks[7], (NUM_LAYERS, FEATURE_SIZE), 0.02),
        "ln2_w": 1.0 + rn(ks[8], (NUM_LAYERS, FEATURE_SIZE), 0.02),
        "ln2_b": rn(ks[9], (NUM_LAYERS, FEATURE_SIZE), 0.02),
        "ff_w1": rn(ks[10], (NUM_LAYERS, D_FF, FEATURE_SIZE), 0.05),
        "ff_b1": rn(ks[11], (NUM_LAYERS, D_FF), 0.02),
        "ff_w2": rn(ks[12], (NUM_LAYERS, FEATURE_SIZE, D_FF), 0.05),
        "ff_b2": rn(ks[13], (NUM_LAYERS, FEATURE_SIZE), 0.02),
        "dec_w": rn(ks[14], (OUTPUT_SIZE, FEATURE_SIZE), 0.2),
        "dec_b": rn(ks[15], (OUTPUT_SIZE,), 0.05),
    }


if __name__ == "__main__":
    key = jax.random.PRNGKey(0)
    kx, kp = jax.random.split(key)
    B, S = 2, 8
    x = jax.random.normal(kx, (B, S, D_IN), jnp.float32)   # (batch, seq, 13)
    params = init_params(kp)

    prepped = prepare_params(params)        # one-time weight plumbing (hoisted)
    fwd = jax.jit(forward_pallas)
    y = jax.block_until_ready(fwd(x, prepped))

    y_ref = forward_reference(x, params)
    assert y.shape == (B, S), y.shape
    max_err = float(jnp.max(jnp.abs(y - y_ref)))
    # Tolerance relaxed vs f32-only because the FF weights are stored/consumed
    # in bfloat16 (per perf review); softmax now uses an exact divide.
    assert jnp.allclose(y, y_ref, atol=5e-2, rtol=5e-2), max_err
    print("KERNEL_OK")
</pallas_src>

<mosaic_0001>
module attributes {stable_mosaic.version = 11 : i64} {
  func.func @kernel(%arg0: i32, %arg1: memref<16x13xf32, #tpu.memory_space<vmem>>, %arg2: memref<13x16xf32, #tpu.memory_space<vmem>>, %arg3: memref<1x16xf32, #tpu.memory_space<vmem>>, %arg4: memref<16x16xf32, #tpu.memory_space<vmem>>, %arg5: memref<16x16xf32, #tpu.memory_space<vmem>>, %arg6: memref<2x1x16xf32, #tpu.memory_space<vmem>>, %arg7: memref<1x16xf32, #tpu.memory_space<vmem>>, %arg8: memref<1x1xf32, #tpu.memory_space<vmem>>, %arg9: memref<1x16x16xf32, #tpu.memory_space<vmem>>, %arg10: memref<1x1x16xf32, #tpu.memory_space<vmem>>, %arg11: memref<1x16x16xf32, #tpu.memory_space<vmem>>, %arg12: memref<1x1x16xf32, #tpu.memory_space<vmem>>, %arg13: memref<1x16x16xf32, #tpu.memory_space<vmem>>, %arg14: memref<1x1x16xf32, #tpu.memory_space<vmem>>, %arg15: memref<1x16x16xf32, #tpu.memory_space<vmem>>, %arg16: memref<1x1x16xf32, #tpu.memory_space<vmem>>, %arg17: memref<1x1x16xf32, #tpu.memory_space<vmem>>, %arg18: memref<1x1x16xf32, #tpu.memory_space<vmem>>, %arg19: memref<1x1x16xf32, #tpu.memory_space<vmem>>, %arg20: memref<1x1x16xf32, #tpu.memory_space<vmem>>, %arg21: memref<1x16x2048xbf16, #tpu.memory_space<vmem>>, %arg22: memref<1x1x2048xf32, #tpu.memory_space<vmem>>, %arg23: memref<1x2048x16xbf16, #tpu.memory_space<vmem>>, %arg24: memref<1x1x16xf32, #tpu.memory_space<vmem>>, %arg25: memref<1x16xf32, #tpu.memory_space<vmem>>, %arg26: memref<16x16xf32, #tpu.memory_space<vmem>>) attributes {dimension_semantics = [#tpu.dimension_semantics<arbitrary>], iteration_bounds = array<i64: 2>, scalar_prefetch = 0 : i64, scratch_operands = 1 : i64, tpu.core_type = #tpu.core_type<tc>, window_params = [{pipeline_mode = #tpu.pipeline_mode<synchronous>, transform_indices = @transform_0, window_bounds = array<i64: 16, 13>}, {pipeline_mode = #tpu.pipeline_mode<synchronous>, transform_indices = @transform_1, window_bounds = array<i64: 13, 16>}, {pipeline_mode = #tpu.pipeline_mode<synchronous>, transform_indices = @transform_2, window_bounds = array<i64: 1, 16>}, {pipeline_mode = #tpu.pipeline_mode<synchronous>, transform_indices = @transform_3, window_bounds = array<i64: 16, 16>}, {pipeline_mode = #tpu.pipeline_mode<synchronous>, transform_indices = @transform_4, window_bounds = array<i64: 16, 16>}, {pipeline_mode = #tpu.pipeline_mode<synchronous>, transform_indices = @transform_5, window_bounds = array<i64: 2, 1, 16>}, {pipeline_mode = #tpu.pipeline_mode<synchronous>, transform_indices = @transform_6, window_bounds = array<i64: 1, 16>}, {pipeline_mode = #tpu.pipeline_mode<synchronous>, transform_indices = @transform_7, window_bounds = array<i64: 1, 1>}, {transform_indices = @transform_8, window_bounds = array<i64: 1, 16, 16>}, {transform_indices = @transform_9, window_bounds = array<i64: 1, 1, 16>}, {transform_indices = @transform_10, window_bounds = array<i64: 1, 16, 16>}, {transform_indices = @transform_11, window_bounds = array<i64: 1, 1, 16>}, {transform_indices = @transform_12, window_bounds = array<i64: 1, 16, 16>}, {transform_indices = @transform_13, window_bounds = array<i64: 1, 1, 16>}, {transform_indices = @transform_14, window_bounds = array<i64: 1, 16, 16>}, {transform_indices = @transform_15, window_bounds = array<i64: 1, 1, 16>}, {transform_indices = @transform_16, window_bounds = array<i64: 1, 1, 16>}, {transform_indices = @transform_17, window_bounds = array<i64: 1, 1, 16>}, {transform_indices = @transform_18, window_bounds = array<i64: 1, 1, 16>}, {transform_indices = @transform_19, window_bounds = array<i64: 1, 1, 16>}, {transform_indices = @transform_20, window_bounds = array<i64: 1, 16, 2048>}, {transform_indices = @transform_21, window_bounds = array<i64: 1, 1, 2048>}, {transform_indices = @transform_22, window_bounds = array<i64: 1, 2048, 16>}, {transform_indices = @transform_23, window_bounds = array<i64: 1, 1, 16>}, {pipeline_mode = #tpu.pipeline_mode<synchronous>, transform_indices = @transform_24, window_bounds = array<i64: 1, 16>}]} {
    %c0_i32 = arith.constant 0 : i32
    %0 = arith.cmpi eq, %arg0, %c0_i32 : i32
    %1 = arith.extui %0 : i1 to i32
    %c0_i32_0 = arith.constant 0 : i32
    %2 = arith.cmpi ne, %1, %c0_i32_0 : i32
    scf.if %2 {
      %c0_86 = arith.constant 0 : index
      %c0_87 = arith.constant 0 : index
      %147 = vector.load %arg1[%c0_86, %c0_87] : memref<16x13xf32, #tpu.memory_space<vmem>>, vector<16x13xf32>
      %c0_88 = arith.constant 0 : index
      %c0_89 = arith.constant 0 : index
      %148 = vector.load %arg2[%c0_88, %c0_89] : memref<13x16xf32, #tpu.memory_space<vmem>>, vector<13x16xf32>
      %cst_90 = arith.constant dense<0.000000e+00> : vector<16x16xf32>
      %149 = tpu.matmul %147, %148, %cst_90 {dimension_numbers = #tpu.dot_dimension_numbers<[1], [0], [0], [1], [0, 0, 1, 1], [], []>} : vector<16x13xf32>, vector<13x16xf32>, vector<16x16xf32> -> vector<16x16xf32>
      %c0_91 = arith.constant 0 : index
      %c0_92 = arith.constant 0 : index
      %150 = vector.load %arg3[%c0_91, %c0_92] : memref<1x16xf32, #tpu.memory_space<vmem>>, vector<1x16xf32>
      %151 = vector.broadcast %150 : vector<1x16xf32> to vector<16x16xf32>
      %152 = arith.addf %149, %151 : vector<16x16xf32>
      %c0_93 = arith.constant 0 : index
      %c0_94 = arith.constant 0 : index
      %153 = vector.load %arg4[%c0_93, %c0_94] : memref<16x16xf32, #tpu.memory_space<vmem>>, vector<16x16xf32>
      %154 = arith.addf %152, %153 : vector<16x16xf32>
      %c0_95 = arith.constant 0 : index
      %c0_96 = arith.constant 0 : index
      %155 = vector.load %arg26[%c0_95, %c0_96] : memref<16x16xf32, #tpu.memory_space<vmem>>, vector<16x16xf32>
      tpu.vector_store %arg26[%c0_95, %c0_96], %154 {strides = array<i32>} : memref<16x16xf32, #tpu.memory_space<vmem>>, vector<16x16xf32>,
    } else {
    }
    %c0 = arith.constant 0 : index
    %c0_1 = arith.constant 0 : index
    %3 = vector.load %arg26[%c0, %c0_1] : memref<16x16xf32, #tpu.memory_space<vmem>>, vector<16x16xf32>
    %c0_2 = arith.constant 0 : index
    %c0_3 = arith.constant 0 : index
    %c0_4 = arith.constant 0 : index
    %4 = vector.load %arg9[%c0_2, %c0_3, %c0_4] : memref<1x16x16xf32, #tpu.memory_space<vmem>>, vector<1x16x16xf32>
    %5 = vector.shape_cast %4 : vector<1x16x16xf32> to vector<16x16xf32>
    %cst = arith.constant dense<0.000000e+00> : vector<16x16xf32>
    %6 = tpu.matmul %3, %5, %cst {dimension_numbers = #tpu.dot_dimension_numbers<[1], [0], [0], [1], [0, 0, 1, 1], [], []>} : vector<16x16xf32>, vector<16x16xf32>, vector<16x16xf32> -> vector<16x16xf32>
    %c0_5 = arith.constant 0 : index
    %c0_6 = arith.constant 0 : index
    %c0_7 = arith.constant 0 : index
    %7 = vector.load %arg10[%c0_5, %c0_6, %c0_7] : memref<1x1x16xf32, #tpu.memory_space<vmem>>, vector<1x1x16xf32>
    %8 = vector.shape_cast %7 : vector<1x1x16xf32> to vector<1x16xf32>
    %9 = vector.broadcast %8 : vector<1x16xf32> to vector<16x16xf32>
    %10 = arith.addf %6, %9 : vector<16x16xf32>
    %c0_8 = arith.constant 0 : index
    %c0_9 = arith.constant 0 : index
    %c0_10 = arith.constant 0 : index
    %11 = vector.load %arg11[%c0_8, %c0_9, %c0_10] : memref<1x16x16xf32, #tpu.memory_space<vmem>>, vector<1x16x16xf32>
    %12 = vector.shape_cast %11 : vector<1x16x16xf32> to vector<16x16xf32>
    %cst_11 = arith.constant dense<0.000000e+00> : vector<16x16xf32>
    %13 = tpu.matmul %3, %12, %cst_11 {dimension_numbers = #tpu.dot_dimension_numbers<[1], [0], [0], [1], [0, 0, 1, 1], [], []>} : vector<16x16xf32>, vector<16x16xf32>, vector<16x16xf32> -> vector<16x16xf32>
    %c0_12 = arith.constant 0 : index
    %c0_13 = arith.constant 0 : index
    %c0_14 = arith.constant 0 : index
    %14 = vector.load %arg12[%c0_12, %c0_13, %c0_14] : memref<1x1x16xf32, #tpu.memory_space<vmem>>, vector<1x1x16xf32>
    %15 = vector.shape_cast %14 : vector<1x1x16xf32> to vector<1x16xf32>
    %16 = vector.broadcast %15 : vector<1x16xf32> to vector<16x16xf32>
    %17 = arith.addf %13, %16 : vector<16x16xf32>
    %c0_15 = arith.constant 0 : index
    %c0_16 = arith.constant 0 : index
    %c0_17 = arith.constant 0 : index
    %18 = vector.load %arg13[%c0_15, %c0_16, %c0_17] : memref<1x16x16xf32, #tpu.memory_space<vmem>>, vector<1x16x16xf32>
    %19 = vector.shape_cast %18 : vector<1x16x16xf32> to vector<16x16xf32>
    %cst_18 = arith.constant dense<0.000000e+00> : vector<16x16xf32>
    %20 = tpu.matmul %3, %19, %cst_18 {dimension_numbers = #tpu.dot_dimension_numbers<[1], [0], [0], [1], [0, 0, 1, 1], [], []>} : vector<16x16xf32>, vector<16x16xf32>, vector<16x16xf32> -> vector<16x16xf32>
    %c0_19 = arith.constant 0 : index
    %c0_20 = arith.constant 0 : index
    %c0_21 = arith.constant 0 : index
    %21 = vector.load %arg14[%c0_19, %c0_20, %c0_21] : memref<1x1x16xf32, #tpu.memory_space<vmem>>, vector<1x1x16xf32>
    %22 = vector.shape_cast %21 : vector<1x1x16xf32> to vector<1x16xf32>
    %23 = vector.broadcast %22 : vector<1x16xf32> to vector<16x16xf32>
    %24 = arith.addf %20, %23 : vector<16x16xf32>
    %c0_22 = arith.constant 0 : index
    %c0_23 = arith.constant 0 : index
    %c0_24 = arith.constant 0 : index
    %25 = vector.load %arg6[%c0_22, %c0_23, %c0_24] : memref<2x1x16xf32, #tpu.memory_space<vmem>>, vector<1x1x16xf32>
    %26 = vector.shape_cast %25 : vector<1x1x16xf32> to vector<1x16xf32>
    %27 = vector.broadcast %26 : vector<1x16xf32> to vector<16x16xf32>
    %28 = arith.mulf %10, %27 : vector<16x16xf32>
    %cst_25 = arith.constant dense<0.000000e+00> : vector<16x16xf32>
    %29 = tpu.matmul %28, %17, %cst_25 {dimension_numbers = #tpu.dot_dimension_numbers<[1], [1], [0], [0], [0, 0, 1, 0], [], []>} : vector<16x16xf32>, vector<16x16xf32>, vector<16x16xf32> -> vector<16x16xf32>
    %c0_26 = arith.constant 0 : index
    %c0_27 = arith.constant 0 : index
    %30 = vector.load %arg5[%c0_26, %c0_27] : memref<16x16xf32, #tpu.memory_space<vmem>>, vector<16x16xf32>
    %31 = arith.addf %29, %30 : vector<16x16xf32>
    %cst_28 = arith.constant dense<0xFF800000> : vector<16xf32>
    %32 = vector.multi_reduction <maximumf>, %31, %cst_28 [1] : vector<16x16xf32> to vector<16xf32>
    %33 = vector.shape_cast %32 : vector<16xf32> to vector<16x1xf32>
    %34 = vector.broadcast %33 : vector<16x1xf32> to vector<16x16xf32>
    %35 = arith.subf %31, %34 : vector<16x16xf32>
    %36 = math.exp %35 : vector<16x16xf32>
    %cst_29 = arith.constant dense<0.000000e+00> : vector<16xf32>
    %37 = vector.multi_reduction <add>, %36, %cst_29 [1] : vector<16x16xf32> to vector<16xf32>
    %38 = vector.shape_cast %37 : vector<16xf32> to vector<16x1xf32>
    %39 = vector.broadcast %38 : vector<16x1xf32> to vector<16x16xf32>
    %40 = arith.divf %36, %39 : vector<16x16xf32>
    %41 = vector.broadcast %26 : vector<1x16xf32> to vector<16x16xf32>
    %42 = arith.mulf %24, %41 : vector<16x16xf32>
    %cst_30 = arith.constant dense<0.000000e+00> : vector<16x16xf32>
    %43 = tpu.matmul %40, %42, %cst_30 {dimension_numbers = #tpu.dot_dimension_numbers<[1], [0], [0], [1], [0, 0, 1, 1], [], []>} : vector<16x16xf32>, vector<16x16xf32>, vector<16x16xf32> -> vector<16x16xf32>
    %c1 = arith.constant 1 : index
    %c0_31 = arith.constant 0 : index
    %c0_32 = arith.constant 0 : index
    %44 = vector.load %arg6[%c1, %c0_31, %c0_32] : memref<2x1x16xf32, #tpu.memory_space<vmem>>, vector<1x1x16xf32>
    %45 = vector.shape_cast %44 : vector<1x1x16xf32> to vector<1x16xf32>
    %46 = vector.broadcast %45 : vector<1x16xf32> to vector<16x16xf32>
    %47 = arith.mulf %10, %46 : vector<16x16xf32>
    %cst_33 = arith.constant dense<0.000000e+00> : vector<16x16xf32>
    %48 = tpu.matmul %47, %17, %cst_33 {dimension_numbers = #tpu.dot_dimension_numbers<[1], [1], [0], [0], [0, 0, 1, 0], [], []>} : vector<16x16xf32>, vector<16x16xf32>, vector<16x16xf32> -> vector<16x16xf32>
    %c0_34 = arith.constant 0 : index
    %c0_35 = arith.constant 0 : index
    %49 = vector.load %arg5[%c0_34, %c0_35] : memref<16x16xf32, #tpu.memory_space<vmem>>, vector<16x16xf32>
    %50 = arith.addf %48, %49 : vector<16x16xf32>
    %cst_36 = arith.constant dense<0xFF800000> : vector<16xf32>
    %51 = vector.multi_reduction <maximumf>, %50, %cst_36 [1] : vector<16x16xf32> to vector<16xf32>
    %52 = vector.shape_cast %51 : vector<16xf32> to vector<16x1xf32>
    %53 = vector.broadcast %52 : vector<16x1xf32> to vector<16x16xf32>
    %54 = arith.subf %50, %53 : vector<16x16xf32>
    %55 = math.exp %54 : vector<16x16xf32>
    %cst_37 = arith.constant dense<0.000000e+00> : vector<16xf32>
    %56 = vector.multi_reduction <add>, %55, %cst_37 [1] : vector<16x16xf32> to vector<16xf32>
    %57 = vector.shape_cast %56 : vector<16xf32> to vector<16x1xf32>
    %58 = vector.broadcast %57 : vector<16x1xf32> to vector<16x16xf32>
    %59 = arith.divf %55, %58 : vector<16x16xf32>
    %60 = vector.broadcast %45 : vector<1x16xf32> to vector<16x16xf32>
    %61 = arith.mulf %24, %60 : vector<16x16xf32>
    %cst_38 = arith.constant dense<0.000000e+00> : vector<16x16xf32>
    %62 = tpu.matmul %59, %61, %cst_38 {dimension_numbers = #tpu.dot_dimension_numbers<[1], [0], [0], [1], [0, 0, 1, 1], [], []>} : vector<16x16xf32>, vector<16x16xf32>, vector<16x16xf32> -> vector<16x16xf32>
    %63 = arith.addf %43, %62 : vector<16x16xf32>
    %c0_39 = arith.constant 0 : index
    %c0_40 = arith.constant 0 : index
    %c0_41 = arith.constant 0 : index
    %64 = vector.load %arg15[%c0_39, %c0_40, %c0_41] : memref<1x16x16xf32, #tpu.memory_space<vmem>>, vector<1x16x16xf32>
    %65 = vector.shape_cast %64 : vector<1x16x16xf32> to vector<16x16xf32>
    %cst_42 = arith.constant dense<0.000000e+00> : vector<16x16xf32>
    %66 = tpu.matmul %63, %65, %cst_42 {dimension_numbers = #tpu.dot_dimension_numbers<[1], [0], [0], [1], [0, 0, 1, 1], [], []>} : vector<16x16xf32>, vector<16x16xf32>, vector<16x16xf32> -> vector<16x16xf32>
    %c0_43 = arith.constant 0 : index
    %c0_44 = arith.constant 0 : index
    %c0_45 = arith.constant 0 : index
    %67 = vector.load %arg16[%c0_43, %c0_44, %c0_45] : memref<1x1x16xf32, #tpu.memory_space<vmem>>, vector<1x1x16xf32>
    %68 = vector.shape_cast %67 : vector<1x1x16xf32> to vector<1x16xf32>
    %69 = vector.broadcast %68 : vector<1x16xf32> to vector<16x16xf32>
    %70 = arith.addf %66, %69 : vector<16x16xf32>
    %71 = arith.addf %3, %70 : vector<16x16xf32>
    %c0_46 = arith.constant 0 : index
    %c0_47 = arith.constant 0 : index
    %c0_48 = arith.constant 0 : index
    %72 = vector.load %arg17[%c0_46, %c0_47, %c0_48] : memref<1x1x16xf32, #tpu.memory_space<vmem>>, vector<1x1x16xf32>
    %73 = vector.shape_cast %72 : vector<1x1x16xf32> to vector<1x16xf32>
    %c0_49 = arith.constant 0 : index
    %c0_50 = arith.constant 0 : index
    %c0_51 = arith.constant 0 : index
    %74 = vector.load %arg18[%c0_49, %c0_50, %c0_51] : memref<1x1x16xf32, #tpu.memory_space<vmem>>, vector<1x1x16xf32>
    %75 = vector.shape_cast %74 : vector<1x1x16xf32> to vector<1x16xf32>
    %cst_52 = arith.constant dense<0.000000e+00> : vector<16xf32>
    %76 = vector.multi_reduction <add>, %71, %cst_52 [1] : vector<16x16xf32> to vector<16xf32>
    %77 = vector.shape_cast %76 : vector<16xf32> to vector<16x1xf32>
    %cst_53 = arith.constant 1.600000e+01 : f32
    %78 = vector.broadcast %cst_53 : f32 to vector<16x1xf32>
    %79 = arith.divf %77, %78 : vector<16x1xf32>
    %80 = vector.broadcast %79 : vector<16x1xf32> to vector<16x16xf32>
    %81 = arith.subf %71, %80 : vector<16x16xf32>
    %82 = arith.mulf %81, %81 : vector<16x16xf32>
    %cst_54 = arith.constant dense<0.000000e+00> : vector<16xf32>
    %83 = vector.multi_reduction <add>, %82, %cst_54 [1] : vector<16x16xf32> to vector<16xf32>
    %84 = vector.shape_cast %83 : vector<16xf32> to vector<16x1xf32>
    %cst_55 = arith.constant 1.600000e+01 : f32
    %85 = vector.broadcast %cst_55 : f32 to vector<16x1xf32>
    %86 = arith.divf %84, %85 : vector<16x1xf32>
    %87 = vector.broadcast %79 : vector<16x1xf32> to vector<16x16xf32>
    %88 = arith.subf %71, %87 : vector<16x16xf32>
    %cst_56 = arith.constant 9.99999974E-6 : f32
    %89 = vector.broadcast %cst_56 : f32 to vector<16x1xf32>
    %90 = arith.addf %86, %89 : vector<16x1xf32>
    %91 = math.rsqrt %90 : vector<16x1xf32>
    %92 = vector.broadcast %91 : vector<16x1xf32> to vector<16x16xf32>
    %93 = arith.mulf %88, %92 : vector<16x16xf32>
    %94 = vector.broadcast %73 : vector<1x16xf32> to vector<16x16xf32>
    %95 = arith.mulf %93, %94 : vector<16x16xf32>
    %96 = vector.broadcast %75 : vector<1x16xf32> to vector<16x16xf32>
    %97 = arith.addf %95, %96 : vector<16x16xf32>
    %98 = arith.truncf %97 : vector<16x16xf32> to vector<16x16xbf16>
    %c0_57 = arith.constant 0 : index
    %c0_58 = arith.constant 0 : index
    %c0_59 = arith.constant 0 : index
    %99 = vector.load %arg21[%c0_57, %c0_58, %c0_59] : memref<1x16x2048xbf16, #tpu.memory_space<vmem>>, vector<1x16x2048xbf16>
    %100 = vector.shape_cast %99 : vector<1x16x2048xbf16> to vector<16x2048xbf16>
    %cst_60 = arith.constant dense<0.000000e+00> : vector<16x2048xf32>
    %101 = tpu.matmul %98, %100, %cst_60 {dimension_numbers = #tpu.dot_dimension_numbers<[1], [0], [0], [1], [0, 0, 1, 1], [], []>} : vector<16x16xbf16>, vector<16x2048xbf16>, vector<16x2048xf32> -> vector<16x2048xf32>
    %c0_61 = arith.constant 0 : index
    %c0_62 = arith.constant 0 : index
    %c0_63 = arith.constant 0 : index
    %102 = vector.load %arg22[%c0_61, %c0_62, %c0_63] : memref<1x1x2048xf32, #tpu.memory_space<vmem>>, vector<1x1x2048xf32>
    %103 = vector.shape_cast %102 : vector<1x1x2048xf32> to vector<1x2048xf32>
    %104 = vector.broadcast %103 : vector<1x2048xf32> to vector<16x2048xf32>
    %105 = arith.addf %101, %104 : vector<16x2048xf32>
    %cst_64 = arith.constant 0.000000e+00 : f32
    %106 = vector.broadcast %cst_64 : f32 to vector<16x2048xf32>
    %107 = arith.maximumf %105, %106 : vector<16x2048xf32>
    %108 = arith.truncf %107 : vector<16x2048xf32> to vector<16x2048xbf16>
    %c0_65 = arith.constant 0 : index
    %c0_66 = arith.constant 0 : index
    %c0_67 = arith.constant 0 : index
    %109 = vector.load %arg23[%c0_65, %c0_66, %c0_67] : memref<1x2048x16xbf16, #tpu.memory_space<vmem>>, vector<1x2048x16xbf16>
    %110 = vector.shape_cast %109 : vector<1x2048x16xbf16> to vector<2048x16xbf16>
    %cst_68 = arith.constant dense<0.000000e+00> : vector<16x16xf32>
    %111 = tpu.matmul %108, %110, %cst_68 {dimension_numbers = #tpu.dot_dimension_numbers<[1], [0], [0], [1], [0, 0, 1, 1], [], []>} : vector<16x2048xbf16>, vector<2048x16xbf16>, vector<16x16xf32> -> vector<16x16xf32>
    %c0_69 = arith.constant 0 : index
    %c0_70 = arith.constant 0 : index
    %c0_71 = arith.constant 0 : index
    %112 = vector.load %arg24[%c0_69, %c0_70, %c0_71] : memref<1x1x16xf32, #tpu.memory_space<vmem>>, vector<1x1x16xf32>
    %113 = vector.shape_cast %112 : vector<1x1x16xf32> to vector<1x16xf32>
    %114 = vector.broadcast %113 : vector<1x16xf32> to vector<16x16xf32>
    %115 = arith.addf %111, %114 : vector<16x16xf32>
    %116 = arith.addf %97, %115 : vector<16x16xf32>
    %c0_72 = arith.constant 0 : index
    %c0_73 = arith.constant 0 : index
    %c0_74 = arith.constant 0 : index
    %117 = vector.load %arg19[%c0_72, %c0_73, %c0_74] : memref<1x1x16xf32, #tpu.memory_space<vmem>>, vector<1x1x16xf32>
    %118 = vector.shape_cast %117 : vector<1x1x16xf32> to vector<1x16xf32>
    %c0_75 = arith.constant 0 : index
    %c0_76 = arith.constant 0 : index
    %c0_77 = arith.constant 0 : index
    %119 = vector.load %arg20[%c0_75, %c0_76, %c0_77] : memref<1x1x16xf32, #tpu.memory_space<vmem>>, vector<1x1x16xf32>
    %120 = vector.shape_cast %119 : vector<1x1x16xf32> to vector<1x16xf32>
    %cst_78 = arith.constant dense<0.000000e+00> : vector<16xf32>
    %121 = vector.multi_reduction <add>, %116, %cst_78 [1] : vector<16x16xf32> to vector<16xf32>
    %122 = vector.shape_cast %121 : vector<16xf32> to vector<16x1xf32>
    %cst_79 = arith.constant 1.600000e+01 : f32
    %123 = vector.broadcast %cst_79 : f32 to vector<16x1xf32>
    %124 = arith.divf %122, %123 : vector<16x1xf32>
    %125 = vector.broadcast %124 : vector<16x1xf32> to vector<16x16xf32>
    %126 = arith.subf %116, %125 : vector<16x16xf32>
    %127 = arith.mulf %126, %126 : vector<16x16xf32>
    %cst_80 = arith.constant dense<0.000000e+00> : vector<16xf32>
    %128 = vector.multi_reduction <add>, %127, %cst_80 [1] : vector<16x16xf32> to vector<16xf32>
    %129 = vector.shape_cast %128 : vector<16xf32> to vector<16x1xf32>
    %cst_81 = arith.constant 1.600000e+01 : f32
    %130 = vector.broadcast %cst_81 : f32 to vector<16x1xf32>
    %131 = arith.divf %129, %130 : vector<16x1xf32>
    %132 = vector.broadcast %124 : vector<16x1xf32> to vector<16x16xf32>
    %133 = arith.subf %116, %132 : vector<16x16xf32>
    %cst_82 = arith.constant 9.99999974E-6 : f32
    %134 = vector.broadcast %cst_82 : f32 to vector<16x1xf32>
    %135 = arith.addf %131, %134 : vector<16x1xf32>
    %136 = math.rsqrt %135 : vector<16x1xf32>
    %137 = vector.broadcast %136 : vector<16x1xf32> to vector<16x16xf32>
    %138 = arith.mulf %133, %137 : vector<16x16xf32>
    %139 = vector.broadcast %118 : vector<1x16xf32> to vector<16x16xf32>
    %140 = arith.mulf %138, %139 : vector<16x16xf32>
    %141 = vector.broadcast %120 : vector<1x16xf32> to vector<16x16xf32>
    %142 = arith.addf %140, %141 : vector<16x16xf32>
    %c0_83 = arith.constant 0 : index
    %c0_84 = arith.constant 0 : index
    %143 = vector.load %arg26[%c0_83, %c0_84] : memref<16x16xf32, #tpu.memory_space<vmem>>, vector<16x16xf32>
    tpu.vector_store %arg26[%c0_83, %c0_84], %142 {strides = array<i32>} : memref<16x16xf32, #tpu.memory_space<vmem>>, vector<16x16xf32>,
    %c1_i32 = arith.constant 1 : i32
    %144 = arith.cmpi eq, %arg0, %c1_i32 : i32
    %145 = arith.extui %144 : i1 to i32
    %c0_i32_85 = arith.constant 0 : i32
    %146 = arith.cmpi ne, %145, %c0_i32_85 : i32
    scf.if %146 {
      %c0_86 = arith.constant 0 : index
      %c0_87 = arith.constant 0 : index
      %147 = vector.load %arg7[%c0_86, %c0_87] : memref<1x16xf32, #tpu.memory_space<vmem>>, vector<1x16xf32>
      %cst_88 = arith.constant dense<0.000000e+00> : vector<1x16xf32>
      %148 = tpu.matmul %147, %142, %cst_88 {dimension_numbers = #tpu.dot_dimension_numbers<[1], [1], [0], [0], [0, 0, 1, 0], [], []>} : vector<1x16xf32>, vector<16x16xf32>, vector<1x16xf32> -> vector<1x16xf32>
      %c0_89 = arith.constant 0 : index
      %c0_90 = arith.constant 0 : index
      %149 = vector.load %arg8[%c0_89, %c0_90] : memref<1x1xf32, #tpu.memory_space<vmem>>, vector<1x1xf32>
      %150 = vector.broadcast %149 : vector<1x1xf32> to vector<1x16xf32>
      %151 = arith.addf %148, %150 : vector<1x16xf32>
      %c0_91 = arith.constant 0 : index
      %c0_92 = arith.constant 0 : index
      %152 = vector.load %arg25[%c0_91, %c0_92] : memref<1x16xf32, #tpu.memory_space<vmem>>, vector<1x16xf32>
      tpu.vector_store %arg25[%c0_91, %c0_92], %151 {strides = array<i32>} : memref<1x16xf32, #tpu.memory_space<vmem>>, vector<1x16xf32>,
    } else {
    }
    return
  }
  func.func @transform_0(%arg0: i32) -> (i32, i32) {
    %c0_i32 = arith.constant 0 : i32
    %c0_i32_0 = arith.constant 0 : i32
    %c0_i32_1 = arith.constant 0 : i32
    return %c0_i32, %c0_i32_0 : i32, i32
  }
  func.func @transform_1(%arg0: i32) -> (i32, i32) {
    %c0_i32 = arith.constant 0 : i32
    %c0_i32_0 = arith.constant 0 : i32
    %c0_i32_1 = arith.constant 0 : i32
    return %c0_i32, %c0_i32_0 : i32, i32
  }
  func.func @transform_2(%arg0: i32) -> (i32, i32) {
    %c0_i32 = arith.constant 0 : i32
    %c0_i32_0 = arith.constant 0 : i32
    %c0_i32_1 = arith.constant 0 : i32
    return %c0_i32, %c0_i32_0 : i32, i32
  }
  func.func @transform_3(%arg0: i32) -> (i32, i32) {
    %c0_i32 = arith.constant 0 : i32
    %c0_i32_0 = arith.constant 0 : i32
    %c0_i32_1 = arith.constant 0 : i32
    return %c0_i32, %c0_i32_0 : i32, i32
  }
  func.func @transform_4(%arg0: i32) -> (i32, i32) {
    %c0_i32 = arith.constant 0 : i32
    %c0_i32_0 = arith.constant 0 : i32
    %c0_i32_1 = arith.constant 0 : i32
    return %c0_i32, %c0_i32_0 : i32, i32
  }
  func.func @transform_5(%arg0: i32) -> (i32, i32, i32) {
    %c0_i32 = arith.constant 0 : i32
    %c0_i32_0 = arith.constant 0 : i32
    %c0_i32_1 = arith.constant 0 : i32
    %c0_i32_2 = arith.constant 0 : i32
    return %c0_i32, %c0_i32_0, %c0_i32_1 : i32, i32, i32
  }
  func.func @transform_6(%arg0: i32) -> (i32, i32) {
    %c0_i32 = arith.constant 0 : i32
    %c0_i32_0 = arith.constant 0 : i32
    %c0_i32_1 = arith.constant 0 : i32
    return %c0_i32, %c0_i32_0 : i32, i32
  }
  func.func @transform_7(%arg0: i32) -> (i32, i32) {
    %c0_i32 = arith.constant 0 : i32
    %c0_i32_0 = arith.constant 0 : i32
    %c0_i32_1 = arith.constant 0 : i32
    return %c0_i32, %c0_i32_0 : i32, i32
  }
  func.func @transform_8(%arg0: i32) -> (i32, i32, i32) {
    %c0_i32 = arith.constant 0 : i32
    %c0_i32_0 = arith.constant 0 : i32
    %c0_i32_1 = arith.constant 0 : i32
    return %arg0, %c0_i32, %c0_i32_0 : i32, i32, i32
  }
  func.func @transform_9(%arg0: i32) -> (i32, i32, i32) {
    %c0_i32 = arith.constant 0 : i32
    %c0_i32_0 = arith.constant 0 : i32
    %c0_i32_1 = arith.constant 0 : i32
    return %arg0, %c0_i32, %c0_i32_0 : i32, i32, i32
  }
  func.func @transform_10(%arg0: i32) -> (i32, i32, i32) {
    %c0_i32 = arith.constant 0 : i32
    %c0_i32_0 = arith.constant 0 : i32
    %c0_i32_1 = arith.constant 0 : i32
    return %arg0, %c0_i32, %c0_i32_0 : i32, i32, i32
  }
  func.func @transform_11(%arg0: i32) -> (i32, i32, i32) {
    %c0_i32 = arith.constant 0 : i32
    %c0_i32_0 = arith.constant 0 : i32
    %c0_i32_1 = arith.constant 0 : i32
    return %arg0, %c0_i32, %c0_i32_0 : i32, i32, i32
  }
  func.func @transform_12(%arg0: i32) -> (i32, i32, i32) {
    %c0_i32 = arith.constant 0 : i32
    %c0_i32_0 = arith.constant 0 : i32
    %c0_i32_1 = arith.constant 0 : i32
    return %arg0, %c0_i32, %c0_i32_0 : i32, i32, i32
  }
  func.func @transform_13(%arg0: i32) -> (i32, i32, i32) {
    %c0_i32 = arith.constant 0 : i32
    %c0_i32_0 = arith.constant 0 : i32
    %c0_i32_1 = arith.constant 0 : i32
    return %arg0, %c0_i32, %c0_i32_0 : i32, i32, i32
  }
  func.func @transform_14(%arg0: i32) -> (i32, i32, i32) {
    %c0_i32 = arith.constant 0 : i32
    %c0_i32_0 = arith.constant 0 : i32
    %c0_i32_1 = arith.constant 0 : i32
    return %arg0, %c0_i32, %c0_i32_0 : i32, i32, i32
  }
  func.func @transform_15(%arg0: i32) -> (i32, i32, i32) {
    %c0_i32 = arith.constant 0 : i32
    %c0_i32_0 = arith.constant 0 : i32
    %c0_i32_1 = arith.constant 0 : i32
    return %arg0, %c0_i32, %c0_i32_0 : i32, i32, i32
  }
  func.func @transform_16(%arg0: i32) -> (i32, i32, i32) {
    %c0_i32 = arith.constant 0 : i32
    %c0_i32_0 = arith.constant 0 : i32
    %c0_i32_1 = arith.constant 0 : i32
    return %arg0, %c0_i32, %c0_i32_0 : i32, i32, i32
  }
  func.func @transform_17(%arg0: i32) -> (i32, i32, i32) {
    %c0_i32 = arith.constant 0 : i32
    %c0_i32_0 = arith.constant 0 : i32
    %c0_i32_1 = arith.constant 0 : i32
    return %arg0, %c0_i32, %c0_i32_0 : i32, i32, i32
  }
  func.func @transform_18(%arg0: i32) -> (i32, i32, i32) {
    %c0_i32 = arith.constant 0 : i32
    %c0_i32_0 = arith.constant 0 : i32
    %c0_i32_1 = arith.constant 0 : i32
    return %arg0, %c0_i32, %c0_i32_0 : i32, i32, i32
  }
  func.func @transform_19(%arg0: i32) -> (i32, i32, i32) {
    %c0_i32 = arith.constant 0 : i32
    %c0_i32_0 = arith.constant 0 : i32
    %c0_i32_1 = arith.constant 0 : i32
    return %arg0, %c0_i32, %c0_i32_0 : i32, i32, i32
  }
  func.func @transform_20(%arg0: i32) -> (i32, i32, i32) {
    %c0_i32 = arith.constant 0 : i32
    %c0_i32_0 = arith.constant 0 : i32
    %c0_i32_1 = arith.constant 0 : i32
    return %arg0, %c0_i32, %c0_i32_0 : i32, i32, i32
  }
  func.func @transform_21(%arg0: i32) -> (i32, i32, i32) {
    %c0_i32 = arith.constant 0 : i32
    %c0_i32_0 = arith.constant 0 : i32
    %c0_i32_1 = arith.constant 0 : i32
    return %arg0, %c0_i32, %c0_i32_0 : i32, i32, i32
  }
  func.func @transform_22(%arg0: i32) -> (i32, i32, i32) {
    %c0_i32 = arith.constant 0 : i32
    %c0_i32_0 = arith.constant 0 : i32
    %c0_i32_1 = arith.constant 0 : i32
    return %arg0, %c0_i32, %c0_i32_0 : i32, i32, i32
  }
  func.func @transform_23(%arg0: i32) -> (i32, i32, i32) {
    %c0_i32 = arith.constant 0 : i32
    %c0_i32_0 = arith.constant 0 : i32
    %c0_i32_1 = arith.constant 0 : i32
    return %arg0, %c0_i32, %c0_i32_0 : i32, i32, i32
  }
  func.func @transform_24(%arg0: i32) -> (i32, i32) {
    %c0_i32 = arith.constant 0 : i32
    %c0_i32_0 = arith.constant 0 : i32
    %c0_i32_1 = arith.constant 0 : i32
    return %c0_i32, %c0_i32_0 : i32, i32
  }
}

</mosaic_0001>

<bundles_post_ra>
// kernel: forward_pallas.1
= control target key start
LH: loop header
LB: loop body
LE: loop exit
PB: predicated region body
PF: predicated region fallthrough
CT: control target
= control target key end

     0   :  { %s4942_s28 = smov 0   ;;  %s5453_s0 = inlined_call_operand.vmem [shape: f32[16,13], index: 0, kind: input, shape index: {}]   ;;  %s5454_s1 = inlined_call_operand.vmem [shape: f32[13,16], index: 1, kind: input, shape index: {}]   ;;  %s5455_s2 = inlined_call_operand.vmem [shape: f32[1,16], index: 2, kind: input, shape index: {}]   ;;  %s5456_s3 = inlined_call_operand.vmem [shape: f32[16,16], index: 3, kind: input, shape index: {}]   ;;  %s5457_s4 = inlined_call_operand.vmem [shape: f32[16,16], index: 4, kind: input, shape index: {}]   ;;  %s5458_s5 = inlined_call_operand.vmem [shape: f32[2,1,16], index: 5, kind: input, shape index: {}]   ;;  %s5459_s6 = inlined_call_operand.vmem [shape: f32[1,16], index: 6, kind: input, shape index: {}]   ;;  %s5460_s7 = inlined_call_operand.<no memory space> [shape: f32[1,1], index: 7, kind: input, shape index: {}]   ;;  %s5461_s8 = inlined_call_operand.vmem [shape: f32[2,16,16], index: 8, kind: input, shape index: {}]   ;;  %s5462_s9 = inlined_call_operand.vmem [shape: f32[2,1,16], index: 9, kind: input, shape index: {}]   ;;  %s5463_s10 = inlined_call_operand.vmem [shape: f32[2,16,16], index: 10, kind: input, shape index: {}]   ;;  %s5464_s11 = inlined_call_operand.vmem [shape: f32[2,1,16], index: 11, kind: input, shape index: {}]   ;;  %s5465_s12 = inlined_call_operand.vmem [shape: f32[2,16,16], index: 12, kind: input, shape index: {}]   ;;  %s5466_s13 = inlined_call_operand.vmem [shape: f32[2,1,16], index: 13, kind: input, shape index: {}]   ;;  %s5467_s14 = inlined_call_operand.vmem [shape: f32[2,16,16], index: 14, kind: input, shape index: {}]   ;;  %s5468_s15 = inlined_call_operand.vmem [shape: f32[2,1,16], index: 15, kind: input, shape index: {}]   ;;  %s5469_s16 = inlined_call_operand.vmem [shape: f32[2,1,16], index: 16, kind: input, shape index: {}]   ;;  %s5470_s17 = inlined_call_operand.vmem [shape: f32[2,1,16], index: 17, kind: input, shape index: {}]   ;;  %s5471_s18 = inlined_call_operand.vmem [shape: f32[2,1,16], index: 18, kind: input, shape index: {}]   ;;  %s5472_s19 = inlined_call_operand.vmem [shape: f32[2,1,16], index: 19, kind: input, shape index: {}]   ;;  %s5473_s20 = inlined_call_operand.vmem [shape: bf16[2,16,2048], index: 20, kind: input, shape index: {}]   ;;  %s5474_s21 = inlined_call_operand.vmem [shape: f32[2,1,2048], index: 21, kind: input, shape index: {}]   ;;  %s5475_s22 = inlined_call_operand.vmem [shape: bf16[2,2048,16], index: 22, kind: input, shape index: {}]   ;;  %s5476_s23 = inlined_call_operand.vmem [shape: f32[2,1,16], index: 23, kind: input, shape index: {}]   ;;  %s5477_s24 = inlined_call_operand.vmem [shape: f32[1,16], index: 24, kind: output, shape index: {}]  }
   0x1   :  { %5486 = sst [smem:[#allocation7_spill]] %s5453_s0 }
   0x2   :  { %5487 = sst [smem:[#allocation8_spill]] %s5454_s1 }
   0x3   :  { %5488 = sst [smem:[#allocation9_spill]] %s5455_s2 }
   0x4   :  { %5489 = sst [smem:[#allocation10_spill]] %s5456_s3 }
   0x5   :  { %5490 = sst [smem:[#allocation11_spill]] %s5457_s4 }
   0x6   :  { %5491 = sst [smem:[#allocation12_spill]] %s5458_s5 }
   0x7   :  { %5492 = sst [smem:[#allocation13_spill]] %s5459_s6 }
   0x8   :  { %5493 = sst [smem:[#allocation14_spill]] %s5460_s7 }
   0x9   :  { %5494 = sst [smem:[#allocation15_spill]] %s5461_s8 }
   0xa   :  { %5495 = sst [smem:[#allocation16_spill]] %s5462_s9 }
   0xb   :  { %5496 = sst [smem:[#allocation17_spill]] %s5463_s10 }
   0xc   :  { %5497 = sst [smem:[#allocation18_spill]] %s5464_s11 }
   0xd   :  { %5498 = sst [smem:[#allocation19_spill]] %s5465_s12 }
   0xe   :  { %5499 = sst [smem:[#allocation20_spill]] %s5467_s14 }
   0xf   :  { %5500 = sst [smem:[#allocation21_spill]] %s5475_s22 }
  0x10   :  { %5501 = sst [smem:[#allocation22_spill]] %s5477_s24 }
  0x11   :  { %s5502_s27 = sld [smem:[#allocation14_spill]] }
  0x17   :  { %v29_v0 = vstv %s5502_s27 }
  0x18   :  { %30 = vst [vmem:[#allocation3] sm:$0x1] %v29_v0 }
  0x19 LB: > { %5503 = sst [smem:[#allocation4_spill]] %s4808_s28  ;;  %s4948_s6 = sadd.s32 4294967295, %s4808_s28   ;;  %s4808_s28 = sphi %s4942_s28, %s36_s28  }
  0x1a   : > { %5504 = sst [smem:[#allocation5_spill]] %s4948_s6  ;;  %p4137_p0 = scmp.ge.s32.totalorder %s4808_s28, 1 }
  0x1b   : > { %p790_p1 = scmp.lt.s32.totalorder %s4808_s28, 3 }
  0x1d   : > { %p791_p2 = pnand %p4137_p0, %p790_p1 }
  0x1f   : > { %794 = sbr.rel (%p791_p2) target bundleno = 2721 (0xaa1), region = 116 }
  0x24   : > { %p907_p3 = scmp.lt.s32.totalorder %s4948_s6, 1  ;;  %s5506_s8 = sld [smem:[#allocation15_spill]] }
  0x25   : > { %s5507_s10 = sld [smem:[#allocation17_spill]] }
  0x26   : > { %s4954_s2 = scalar_select %p907_p3, %s4948_s6, 1 }
  0x27   : > { %s5509_s12 = sld [smem:[#allocation19_spill]] }
  0x28   : > { %s4346_s29 = sshll.u32 %s4954_s2, 4  ;;  %s5510_s14 = sld [smem:[#allocation20_spill]] }
  0x29   : > { %s5018_s24 = scalar_lea.vmem %s5474_s21, %s4346_s29  ;;  %s4351_s22 = sshll.u32 %s4954_s2, 10 }
  0x2a   : > { %s4964_s4 = scalar_lea.vmem %s5506_s8, %s4346_s29  ;;  %s967_s11 = scalar_lea.vmem %s5476_s23, %s4954_s2 }
  0x2b   : > { %s4969_s26 = scalar_lea.vmem %s5507_s10, %s4346_s29  ;;  %s938_s10 = scalar_lea.vmem %s5468_s15, %s4954_s2 }
  0x2c   : > { %s5512_s3 = sld [smem:[#allocation21_spill]] }
  0x2d   : > { %s4978_s0 = scalar_lea.vmem %s5509_s12, %s4346_s29  ;;  %s5513_s8 = sld [smem:[#allocation5_spill]] }
  0x2e   : > { %s4987_s9 = scalar_lea.vmem %s5510_s14, %s4346_s29  ;;  %s4350_s14 = sshll.u32 %s4954_s2, 7 }
  0x2f   : > { %5511 = sst [smem:[#allocation6_spill]] %s4987_s9  ;;  %s5013_s5 = scalar_lea.vmem %s5473_s20, %s4350_s14 }
  0x32   : > { %s5028_s25 = scalar_lea.vmem %s5512_s3, %s4351_s22 }
  0x33   : > { %p4151_p4 = scmp.ne.s32.totalorder %s5513_s8, 0 }
  0x34   : > { %s5514_s1 = sld [smem:[#allocation8_spill]] (!%p4151_p4) }
  0x35   : > { %972 = sbr.rel (%p4151_p4) target bundleno = 263 (0x107), region = 120  ;;  %s5515_s6 = sld [smem:[#allocation7_spill]] (!%p4151_p4) }
  0x36   : > { %s5516_s3 = sld [smem:[#allocation9_spill]] (!%p4151_p4) }
  0x37   : > { %s5517_s29 = sld [smem:[#allocation10_spill]] (!%p4151_p4) }
  0x3a   : > { %v976_v1 = vld [vmem:[%s5514_s1 + $0x8] sm:$0x1f]  ;;  %vm991_vm0 = vcmask 1044480   ;;  %v975_v2 = vld [vmem:[%s5514_s1] sm:$0xff]  ;;  %vm984_vm1 = vcmask 105472   ;;  %vm1074_vm2 = vcmask 130048  }
  0x3b   : > { %v973_v3 = vld [vmem:[%s5515_s6] sm:$0xff]  ;;  %4567 = vmatprep.subr.msk.mxu0 %vm991_vm0, %v976_v1  ;;  %v974_v4 = vld [vmem:[%s5515_s6 + $0x8] sm:$0xff] }
  0x3c   : > { %4571 = vmatprep.mubr.msk.f32.mxu0 %vm984_vm1, %v973_v3  ;;  %4568 = vmatpush3.msk.msra.mxu0 %vm991_vm0, %v976_v1  ;;  %v4152_v5 = vld [vmem:[%s5516_s3] ss:$0 sm:$0xff] }
  0x3d   : > { %4569 = vmatprep.subr.mxu0 %v975_v2  ;;  %v1071_v7 = vld [vmem:[%s5517_s29 + $0x8] sm:$0xff]  ;;  %v1070_v10 = vld [vmem:[%s5517_s29] sm:$0xff] }
  0x3e   : > { %4570 = vmatpush3.msra.mxu0 %v975_v2 }
  0x3f   : > { %4572 = vmatmul.mubr.msk.f32.vlgmr.msra.gmra.mxu0 %vm984_vm1, %v974_v4 }
  0xff   : > { %v4573_v6 = vpop.f32.mrf.mxu0 }
 0x100   : > { %v1067_v8 = vadd.f32 %v4573_v6, %v4152_v5 }
 0x101   : > { %v1061_v9 = vpop.f32.mrf.mxu0 }
 0x102   : > { %v1073_v11 = vadd.f32 %v1071_v7, %v1067_v8  ;;  %v1062_v12 = vadd.f32 %v4152_v5, %v1061_v9 }
 0x104   : > { %1076 = vst.msk [vmem:[#allocation2 + $0x8] sm:$0xff] %vm1074_vm2, %v1073_v11  ;;  %v1072_v13 = vadd.f32 %v1070_v10, %v1062_v12 }
 0x106   : > { %1075 = vst.msk [vmem:[#allocation2] sm:$0xff] %vm1074_vm2, %v1072_v13 }
 0x107 PF: > { %v1171_v14 = vld [vmem:[%s4969_s26 + $0x8] sm:$0xff]  ;;  %v1170_v16 = vld [vmem:[%s4969_s26] sm:$0xff]  ;;  %vm1088_vm3 = vcmask 130048   ;;  %s5518_s12 = sld [smem:[#allocation18_spill]]  ;;  %s5528_s8 = scalar_lea.vmem %s5471_s18, %s4954_s2 }
 0x108   : > { %v1080_v15 = vld [vmem:[%s4964_s4 + $0x8] sm:$0xff]  ;;  %4581 = vmatprep.subr.mxu1 %v1171_v14  ;;  %v1079_v17 = vld [vmem:[%s4964_s4] sm:$0xff]  ;;  %s5520_s30 = sld [smem:[#allocation16_spill]]  ;;  %s5526_s4 = scalar_lea.vmem %s5469_s16, %s4954_s2 }
 0x109   : > { %4574 = vmatprep.subr.mxu0 %v1080_v15  ;;  %4582 = vmatpush3.msra.mxu1 %v1171_v14  ;;  %v1255_v20 = vld [vmem:[%s4978_s0 + $0x8] sm:$0xff]  ;;  %v1254_v21 = vld [vmem:[%s4978_s0] sm:$0xff]  ;;  %s5522_s14 = sld [smem:[#allocation12_spill]] }
 0x10a   : > { %4575 = vmatpush3.msra.mxu0 %v1080_v15  ;;  %4583 = vmatprep.subr.mxu1 %v1170_v16  ;;  %s5524_s22 = sld [smem:[#allocation11_spill]] }
 0x10b   : > { %v5058_v19 = vld [vmem:[#allocation2 + $0x8] sm:$0xff]  ;;  %4576 = vmatprep.subr.mxu0 %v1079_v17  ;;  %4584 = vmatpush3.msra.mxu1 %v1170_v16  ;;  %s5525_s9 = sld [smem:[#allocation6_spill]] }
 0x10c   : > { %4577 = vmatpush3.msra.mxu0 %v1079_v17  ;;  %s5530_s0 = sld [smem:[#allocation5_spill]] }
 0x10d   : > { %v5056_v18 = vld [vmem:[#allocation2] sm:$0xff]  ;;  %4588 = vmatprep.subr.mxu0 %v1255_v20  ;;  %s5519_s7 = scalar_lea.vmem %s5518_s12, %s4954_s2  ;;  %s5523_s12 = scalar_lea.vmem %s5466_s13, %s4954_s2 }
 0x10e   : > { %4585 = vmatprep.mubr.msk.f32.mxu1 %vm1088_vm3, %v5056_v18  ;;  %4578 = vmatprep.mubr.msk.f32.mxu0 %vm1088_vm3, %v5056_v18  ;;  %v4159_v22 = vld [vmem:[%s5519_s7] ss:$0 sm:$0xff]  ;;  %s5521_s3 = scalar_lea.vmem %s5520_s30, %s4954_s2  ;;  %s5527_s7 = scalar_lea.vmem %s5470_s17, %s4954_s2 }
 0x10f   : > { %4586 = vmatmul.mubr.msk.f32.vlgmr.msra.gmra.mxu1 %vm1088_vm3, %v5058_v19  ;;  %4579 = vmatmul.mubr.msk.f32.vlgmr.msra.gmra.mxu0 %vm1088_vm3, %v5058_v19  ;;  %v4156_v25 = vld [vmem:[%s5521_s3] ss:$0 sm:$0xff]  ;;  %v4171_v28 = vld [vmem:[%s5522_s14 + $0x1] ss:$0 sm:$0xff] }
 0x110   : > { %4592 = vmatprep.mubr.msk.f32.mxu0 %vm1088_vm3, %v5056_v18  ;;  %4589 = vmatpush3.msra.mxu0 %v1255_v20  ;;  %v4165_v27 = vld [vmem:[%s5522_s14] ss:$0 sm:$0xff]  ;;  %v1348_v47 = vld [vmem:[%s5524_s22 + $0x8] sm:$0xff] }
 0x111   : > { %4590 = vmatprep.subr.mxu0 %v1254_v21  ;;  %v4162_v38 = vld [vmem:[%s5523_s12] ss:$0 sm:$0xff] }
 0x112   : > { %4591 = vmatpush3.msra.mxu0 %v1254_v21  ;;  %v1347_v49 = vld [vmem:[%s5524_s22] sm:$0xff]  ;;  %p4340_p5 = scmp.ne.s32.totalorder %s5530_s0, 1 }
 0x113   : > { %4593 = vmatmul.mubr.msk.f32.vlgmr.msra.gmra.mxu0 %vm1088_vm3, %v5058_v19  ;;  %s5532_s26 = sld [smem:[#allocation22_spill]] (!%p4340_p5) }
 0x1cf   : > { %v4587_v23 = vpop.f32.mrf.mxu1  ;;  %v4580_v24 = vpop.f32.mrf.mxu0 }
 0x1d0   : > { %v1251_v26 = vadd.f32 %v4587_v23, %v4159_v22  ;;  %v1167_v33 = vadd.f32 %v4580_v24, %v4156_v25 }
 0x1d1   : > { %v1245_v29 = vpop.f32.mrf.mxu1  ;;  %v1161_v30 = vpop.f32.mrf.mxu0 }
 0x1d2   : > { %v1246_v31 = vadd.f32 %v4159_v22, %v1245_v29  ;;  %v1162_v32 = vadd.f32 %v4156_v25, %v1161_v30  ;;  %4595 = vmatprep.subr.msk.mxu1 %vm1088_vm3, %v1251_v26  ;;  %4602 = vmatprep.subr.msk.mxu0 %vm1088_vm3, %v1251_v26  ;;  %v1346_v36 = vmul.f32 %v4165_v27, %v1167_v33 }
 0x1d3   : > { %4596 = vmatpush3.xpose.msk.msra.mxu1 %vm1088_vm3, %v1251_v26  ;;  %4603 = vmatpush3.xpose.msk.msra.mxu0 %vm1088_vm3, %v1251_v26  ;;  %v1469_v37 = vmul.f32 %v4171_v28, %v1167_v33  ;;  %v4594_v39 = vpop.f32.mrf.mxu0 }
 0x1d4   : > { %v1345_v34 = vmul.f32 %v4165_v27, %v1162_v32  ;;  %v1468_v35 = vmul.f32 %v4171_v28, %v1162_v32  ;;  %4597 = vmatprep.subr.msk.mxu1 %vm1088_vm3, %v1246_v31  ;;  %4604 = vmatprep.subr.msk.mxu0 %vm1088_vm3, %v1246_v31  ;;  %v1335_v40 = vadd.f32 %v4594_v39, %v4162_v38  ;;  %v1737_v32 = vld [vmem:[%s5525_s9] sm:$0xff] }
 0x1d5   : > { %v1329_v41 = vpop.f32.mrf.mxu0  ;;  %v4180_v39 = vld [vmem:[%s938_s10] ss:$0 sm:$0xff]  ;;  %s5531_s10 = sld [smem:[#allocation13_spill]] (!%p4340_p5) }
 0x1d6   : > { %4599 = vmatprep.mubr.msk.f32.mxu1 %vm1088_vm3, %v1345_v34  ;;  %4606 = vmatprep.mubr.msk.f32.mxu0 %vm1088_vm3, %v1468_v35  ;;  %v1459_v42 = vmul.f32 %v4165_v27, %v1335_v40  ;;  %v1574_v43 = vmul.f32 %v4171_v28, %v1335_v40  ;;  %v1330_v44 = vadd.f32 %v4162_v38, %v1329_v41 }
 0x1d7   : > { %4598 = vmatpush3.xpose.msk.msra.mxu1 %vm1088_vm3, %v1246_v31  ;;  %4605 = vmatpush3.xpose.msk.msra.mxu0 %vm1088_vm3, %v1246_v31  ;;  %v1738_v31 = vld [vmem:[%s5525_s9 + $0x8] sm:$0xff]  ;;  %s5529_s9 = scalar_lea.vmem %s5472_s19, %s4954_s2 }
 0x1d8   : > { %v1458_v45 = vmul.f32 %v4165_v27, %v1330_v44  ;;  %v1573_v46 = vmul.f32 %v4171_v28, %v1330_v44  ;;  %4609 = vmatprep.subr.mxu1 %v1574_v43  ;;  %4616 = vmatprep.subr.mxu0 %v1459_v42 }
 0x1da   : > { %4600 = vmatmul.mubr.msk.f32.vlgmr.msra.gmra.mxu1 %vm1088_vm3, %v1346_v36  ;;  %4607 = vmatmul.mubr.msk.f32.vlgmr.msra.gmra.mxu0 %vm1088_vm3, %v1469_v37 }
 0x1db   : > { %4610 = vmatpush3.msra.mxu1 %v1574_v43  ;;  %4617 = vmatpush3.msra.mxu0 %v1459_v42 }
 0x1dc   : > { %4611 = vmatprep.subr.mxu1 %v1573_v46  ;;  %4618 = vmatprep.subr.mxu0 %v1458_v45 }
 0x1dd   : > { %4612 = vmatpush3.msra.mxu1 %v1573_v46  ;;  %4619 = vmatpush3.msra.mxu0 %v1458_v45 }
 0x1de   : > { %4623 = vmatprep.subr.mxu1 %v1738_v31 }
 0x29a   : > { %v4601_v48 = vpop.f32.mrf.mxu1  ;;  %v4608_v51 = vpop.f32.mrf.mxu0 }
 0x29b   : > { %v1433_v50 = vadd.f32 %v4601_v48, %v1348_v47  ;;  %v1548_v53 = vadd.f32 %v4608_v51, %v1348_v47 }
 0x29c   : > { %v1427_v52 = vpop.f32.mrf.mxu1  ;;  %v1542_v55 = vpop.f32.mrf.mxu0 }
 0x29d   : > { %v1428_v54 = vadd.f32 %v1427_v52, %v1347_v49  ;;  %v1439_v56 = vsel %vm1088_vm3, %v1433_v50, -inf  ;;  %v1543_v57 = vadd.f32 %v1542_v55, %v1347_v49  ;;  %v1554_v59 = vsel %vm1088_vm3, %v1548_v53, -inf }
 0x29e   : > { %1440 = vmax.xlane.f32.xlu1 %v1439_v56  ;;  %v1875_v56 = vld [vmem:[%s5013_s5] sm:$0xff] }
 0x29f   : > { %v1436_v58 = vsel %vm1088_vm3, %v1428_v54, -inf  ;;  %v1551_v60 = vsel %vm1088_vm3, %v1543_v57, -inf }
 0x2a0   : > { %1437 = vmax.xlane.f32.xlu0 %v1436_v58  ;;  %v1876_v58 = vld [vmem:[%s5013_s5 + $0x8] sm:$0xff] }
 0x2a2   : > { %1555 = vmax.xlane.f32.xlu1 %v1554_v59 }
 0x2a4   : > { %1552 = vmax.xlane.f32.xlu0 %v1551_v60  ;;  %v1884_v60 = vld [vmem:[%s5013_s5 + $0x48] sm:$0xff] }
 0x327   : > { %v1441_v61 = vpop.xlane.xlu1 %1440 }
 0x328   : > { %v1443_v62 = vsub.f32 %v1433_v50, %v1441_v61 }
 0x329   : > { %v1438_v63 = vpop.xlane.xlu0 %1437 }
 0x32a   : > { %v1442_v0 = vsub.f32 %v1428_v54, %v1438_v63  ;;  %v1446_v2 = vmul.f32 1.442695, %v1443_v62  ;;  %v4187_v62 = vcombine.low %v1876_v58, %v1884_v60  ;;  %v4188_v63 = vcombine.high %v1876_v58, %v1884_v60  ;;  %v4665_v58 = vld [vmem:[%s5028_s25 + $0x58] sm:$0xff]  }
 0x32b   : > { %v1556_v1 = vpop.xlane.xlu1 %1555  ;;  %v4667_v60 = vld [vmem:[%s5028_s25 + $0x18] sm:$0xff]  }
 0x32c   : > { %v1444_v3 = vmul.f32 1.442695, %v1442_v0  ;;  %v1558_v4 = vsub.f32 %v1548_v53, %v1556_v1  ;;  %v4810_v0 = vmov 0   ;;  %v1877_v1 = vld [vmem:[%s5013_s5 + $0x10] sm:$0xff] }
 0x32d   : > { %v1553_v5 = vpop.xlane.xlu0 %1552 }
 0x32e   : > { %4777 = vpow2.f32 %v1444_v3  ;;  %v1557_v6 = vsub.f32 %v1543_v57, %v1553_v5  ;;  %v1561_v7 = vmul.f32 1.442695, %v1558_v4  ;;  %v1883_v57 = vld [vmem:[%s5013_s5 + $0x40] sm:$0xff]  ;;  %v1878_v3 = vld [vmem:[%s5013_s5 + $0x18] sm:$0xff] }
 0x32f   : > { %4779 = vpow2.f32 %v1446_v2  ;;  %v4186_v59 = vcombine.high %v1875_v56, %v1883_v57  ;;  %v4185_v61 = vcombine.low %v1875_v56, %v1883_v57  ;;  %v1885_v2 = vld [vmem:[%s5013_s5 + $0x50] sm:$0xff]  ;;  %v4663_v56 = vld [vmem:[%s5028_s25 + $0x20] sm:$0xff]  }
 0x330   : > { %v1559_v8 = vmul.f32 1.442695, %v1557_v6  ;;  %v4189_v4 = vcombine.low %v1877_v1, %v1885_v2  ;;  %v4190_v5 = vcombine.high %v1877_v1, %v1885_v2  ;;  %v1886_v6 = vld [vmem:[%s5013_s5 + $0x58] sm:$0xff]  ;;  %v4664_v57 = vld [vmem:[%s5028_s25 + $0xa0] sm:$0xff]   ;;  %v4672_v1 = vld [vmem:[%s5028_s25 + $0x90] sm:$0xff]  }
 0x331   : > { %2072 = vmatprep.subr.bf16.mxu0 %v4186_v59  ;;  %v4666_v59 = vld [vmem:[%s5028_s25 + $0xd8] sm:$0xff]   ;;  %v4673_v2 = vld [vmem:[%s5028_s25 + $0x48] sm:$0xff]  }
 0x332   : > { %4781 = vpow2.f32 %v1559_v8  ;;  %v4192_v8 = vcombine.high %v1878_v3, %v1886_v6 }
 0x333   : > { %4783 = vpow2.f32 %v1561_v7  ;;  %v4191_v7 = vcombine.low %v1878_v3, %v1886_v6  ;;  %v4674_v3 = vld [vmem:[%s5028_s25 + $0xc8] sm:$0xff]   ;;  %v4677_v6 = vld [vmem:[%s5028_s25 + $0x40] sm:$0xff]  }
 0x33b   : > { %v4778_v9 = vpop.eup %4777 }
 0x33c   : > { %v1448_v10 = vsel %vm1088_vm3, %v4778_v9, 0.0  ;;  %v4780_v11 = vpop.eup %4779 }
 0x33d   : > { %1449 = vadd.xlane.f32.xlu0 %v1448_v10  ;;  %v1451_v13 = vsel %vm1088_vm3, %v4780_v11, 0.0 }
 0x33f   : > { %v4782_v12 = vpop.eup %4781 }
 0x340   : > { %v1563_v14 = vsel %vm1088_vm3, %v4782_v12, 0.0  ;;  %v4784_v15 = vpop.eup %4783 }
 0x341   : > { %1452 = vadd.xlane.f32.xlu0 %v1451_v13  ;;  %1564 = vadd.xlane.f32.xlu1 %v1563_v14  ;;  %v1566_v16 = vsel %vm1088_vm3, %v4784_v15, 0.0 }
 0x345   : > { %1567 = vadd.xlane.f32.xlu1 %v1566_v16  ;;  %v4183_v16 = vld [vmem:[%s5526_s4] ss:$0 sm:$0xff] }
 0x3c6   : > { %v1450_v17 = vpop.xlane.xlu0 %1449 }
 0x3c7   : > { %4785 = vrcp.f32 %v1450_v17 }
 0x3ca   : > { %v1565_v20 = vpop.xlane.xlu1 %1564  ;;  %v1453_v21 = vpop.xlane.xlu0 %1452 }
 0x3cb   : > { %4787 = vrcp.f32 %v1565_v20 }
 0x3cc   : > { %4789 = vrcp.f32 %v1453_v21 }
 0x3ce   : > { %v1568_v22 = vpop.xlane.xlu1 %1567 }
 0x3cf   : > { %4791 = vrcp.f32 %v1568_v22 }
 0x3d4   : > { %v4786_v23 = vpop.eup %4785 }
 0x3d5   : > { %v1455_v24 = vmul.f32 %v4786_v23, %v4778_v9  ;;  %v4184_v23 = vld [vmem:[%s5527_s7] ss:$0 sm:$0xff] }
 0x3d7   : > { %4620 = vmatprep.mubr.msk.f32.mxu0 %vm1088_vm3, %v1455_v24 }
 0x3d8   : > { %v4788_v25 = vpop.eup %4787 }
 0x3d9   : > { %v4790_v26 = vpop.eup %4789  ;;  %v1570_v27 = vmul.f32 %v4788_v25, %v4782_v12  ;;  %v1879_v25 = vld [vmem:[%s5013_s5 + $0x20] sm:$0xff] }
 0x3da   : > { %v1457_v28 = vmul.f32 %v4790_v26, %v4780_v11 }
 0x3db   : > { %4613 = vmatprep.mubr.msk.f32.mxu1 %vm1088_vm3, %v1570_v27 }
 0x3dc   : > { %v4792_v29 = vpop.eup %4791  ;;  %4621 = vmatmul.mubr.msk.f32.vlgmr.msra.gmra.mxu0 %vm1088_vm3, %v1457_v28  ;;  %v1887_v28 = vld [vmem:[%s5013_s5 + $0x60] sm:$0xff] }
 0x3dd   : > { %v1572_v30 = vmul.f32 %v4792_v29, %v4784_v15  ;;  %2073 = vmatpush1.bf16.msra.mxu0 %v4185_v61  ;;  %2090 = vmatprep.mubr.bf16.mxu0 %v4810_v0  ;;  %v1880_v29 = vld [vmem:[%s5013_s5 + $0x28] sm:$0xff]  ;;  %v4668_v61 = vld [vmem:[%s5028_s25 + $0x98] sm:$0xff]  }
 0x3de   : > { %2158 = vmatprep.subr.bf16.mxu0 %v4190_v5  ;;  %v4676_v5 = vld [vmem:[%s5028_s25 + $0x88] sm:$0xff]  }
 0x3df   : > { %4614 = vmatmul.mubr.msk.f32.vlgmr.msra.gmra.mxu1 %vm1088_vm3, %v1572_v30  ;;  %v1888_v30 = vld [vmem:[%s5013_s5 + $0x68] sm:$0xff] }
 0x3e0   : > { %4624 = vmatpush3.msra.mxu1 %v1738_v31 }
 0x3e1   : > { %4625 = vmatprep.subr.mxu1 %v1737_v32 }
 0x3e2   : > { %4626 = vmatpush3.msra.mxu1 %v1737_v32  ;;  %v4194_v32 = vcombine.high %v1879_v25, %v1887_v28 }
 0x3e3   : > { %2115 = vmatprep.subr.bf16.mxu1 %v4188_v63  ;;  %v4670_v63 = vld [vmem:[%s5028_s25 + $0xd0] sm:$0xff]  }
 0x49c   : > { %v4622_v33 = vpop.f32.mrf.mxu0 }
 0x49e   : > { %v1728_v35 = vpop.f32.mrf.mxu0 }
 0x49f   : > { %v4615_v34 = vpop.f32.mrf.mxu1 }
 0x4a0   : > { %v1734_v38 = vadd.f32 %v4622_v33, %v4615_v34  ;;  %v4196_v33 = vcombine.high %v1880_v29, %v1888_v30  ;;  %v1881_v34 = vld [vmem:[%s5013_s5 + $0x30] sm:$0xff] }
 0x4a1   : > { %v1647_v36 = vpop.f32.mrf.mxu1 }
 0x4a2   : > { %v1729_v37 = vadd.f32 %v1728_v35, %v1647_v36  ;;  %v1889_v35 = vld [vmem:[%s5013_s5 + $0x70] sm:$0xff]  ;;  %v1882_v36 = vld [vmem:[%s5013_s5 + $0x38] sm:$0xff] }
 0x4a4   : > { %4627 = vmatprep.mubr.msk.f32.mxu1 %vm1088_vm3, %v1729_v37  ;;  %v1890_v37 = vld [vmem:[%s5013_s5 + $0x78] sm:$0xff] }
 0x4a5   : > { %4628 = vmatmul.mubr.msk.f32.vlgmr.msra.gmra.mxu1 %vm1088_vm3, %v1734_v38  ;;  %v4193_v38 = vcombine.low %v1879_v25, %v1887_v28 }
 0x4a6   : > { %2116 = vmatpush1.bf16.msra.mxu1 %v4187_v62  ;;  %2133 = vmatprep.mubr.bf16.mxu1 %v4810_v0  ;;  %v4669_v62 = vld [vmem:[%s5028_s25 + $0x50] sm:$0xff]  }
 0x4a7   : > { %2201 = vmatprep.subr.bf16.mxu1 %v4192_v8  ;;  %v4679_v8 = vld [vmem:[%s5028_s25] sm:$0xff]  }
 0x565   : > { %v4629_v40 = vpop.f32.mrf.mxu1 }
 0x566   : > { %v1824_v41 = vadd.f32 %v4629_v40, %v4180_v39  ;;  %v4198_v40 = vcombine.high %v1881_v34, %v1889_v35 }
 0x567   : > { %v1818_v42 = vpop.f32.mrf.mxu1 }
 0x568   : > { %v1819_v43 = vadd.f32 %v4180_v39, %v1818_v42  ;;  %v1828_v44 = vadd.f32 %v1824_v41, %v5058_v19  ;;  %v4195_v39 = vcombine.low %v1880_v29, %v1888_v30  ;;  %v4200_v41 = vcombine.high %v1882_v36, %v1890_v37 }
 0x569   : > { %v4197_v42 = vcombine.low %v1881_v34, %v1889_v35 }
 0x56a   : > { %v1834_v45 = vsel %vm1088_vm3, %v1828_v44, 0.0  ;;  %v1827_v46 = vadd.f32 %v1819_v43, %v5056_v18  ;;  %v4199_v43 = vcombine.low %v1882_v36, %v1890_v37 }
 0x56b   : > { %1835 = vadd.xlane.f32.xlu1 %v1834_v45  ;;  %v4650_v45 = vld [vmem:[%s5028_s25 + $0xf8] sm:$0xff]  }
 0x56c   : > { %v1831_v47 = vsel %vm1088_vm3, %v1827_v46, 0.0 }
 0x56d   : > { %1832 = vadd.xlane.f32.xlu0 %v1831_v47  ;;  %v4652_v47 = vld [vmem:[%s5028_s25 + $0xb8] sm:$0xff]  }
 0x5f4   : > { %v1836_v48 = vpop.xlane.xlu1 %1835 }
 0x5f5   : > { %v1839_v49 = vmul.f32 0.0625, %v1836_v48  ;;  %v4653_v48 = vld [vmem:[%s5028_s25 + $0x70] sm:$0xff]  }
 0x5f6   : > { %v1833_v50 = vpop.xlane.xlu0 %1832 }
 0x5f7   : > { %v1841_v51 = vsub.f32 %v1828_v44, %v1839_v49  ;;  %v1838_v52 = vmul.f32 0.0625, %v1833_v50  ;;  %v4649_v44 = vld [vmem:[%s5028_s25 + $0x78] sm:$0xff]   ;;  %v4654_v49 = vld [vmem:[%s5028_s25 + $0xf0] sm:$0xff]  }
 0x5f8   : > { %v4655_v50 = vld [vmem:[%s5028_s25 + $0x30] sm:$0xff]  }
 0x5f9   : > { %v1840_v53 = vsub.f32 %v1827_v46, %v1838_v52  ;;  %v1843_v54 = vmul.f32 %v1841_v51, %v1841_v51  ;;  %v4651_v46 = vld [vmem:[%s5028_s25 + $0x38] sm:$0xff]   ;;  %v4657_v52 = vld [vmem:[%s5028_s25 + $0x68] sm:$0xff]  }
 0x5fb   : > { %v1847_v19 = vsel %vm1088_vm3, %v1843_v54, 0.0  ;;  %v1842_v55 = vmul.f32 %v1840_v53, %v1840_v53  ;;  %v4659_v54 = vld [vmem:[%s5028_s25 + $0x28] sm:$0xff]  }
 0x5fc   : > { %1848 = vadd.xlane.f32.xlu1 %v1847_v19  ;;  %v4660_v19 = vld [vmem:[%s5028_s25 + $0xa8] sm:$0xff]  }
 0x5fd   : > { %v1844_v18 = vsel %vm1088_vm3, %v1842_v55, 0.0  ;;  %v4661_v55 = vld [vmem:[%s5028_s25 + $0x60] sm:$0xff]  }
 0x5fe   : > { %1845 = vadd.xlane.f32.xlu0 %v1844_v18  ;;  %v4662_v18 = vld [vmem:[%s5028_s25 + $0xe0] sm:$0xff]  }
 0x685   : > { %v1849_v9 = vpop.xlane.xlu1 %1848 }
 0x686   : > { %v1851_v10 = vmul.f32 0.0625, %v1849_v9  ;;  %v4680_v9 = vld [vmem:[%s5028_s25 + $0x80] sm:$0xff]  }
 0x687   : > { %v1846_v11 = vpop.xlane.xlu0 %1845 }
 0x688   : > { %v1853_v12 = vadd.f32 1e-05, %v1851_v10  ;;  %v1850_v13 = vmul.f32 0.0625, %v1846_v11  ;;  %v4681_v10 = vld [vmem:[%s5028_s25 + $0x178] sm:$0xff]  }
 0x689   : > { %v4682_v11 = vld [vmem:[%s5028_s25 + $0x1f8] sm:$0xff]  }
 0x68a   : > { %4793 = vrsqrt.f32 %v1853_v12  ;;  %v1852_v14 = vadd.f32 1e-05, %v1850_v13  ;;  %v1895_v12 = vlaneseq }
 0x68c   : > { %4795 = vrsqrt.f32 %v1852_v14  ;;  %v5222_v13 = vshrl.u32 %v1895_v12, 7 }
 0x68e   : > { %v1901_v14 = vsub.s32 1, %v5222_v13  ;;  %v1925_v34 = vsub.s32 7, %v5222_v13 }
 0x697   : > { %v4794_v15 = vpop.eup %4793 }
 0x698   : > { %v1857_v17 = vmul.f32 %v4794_v15, %v1841_v51  ;;  %v4656_v51 = vld [vmem:[%s5028_s25 + $0xb0] sm:$0xff]   ;;  %v1909_v15 = vsub.s32 3, %v5222_v13 }
 0x699   : > { %v4796_v20 = vpop.eup %4795 }
 0x69a   : > { %v1865_v21 = vmul.f32 %v4183_v16, %v1857_v17  ;;  %v1856_v22 = vmul.f32 %v4796_v20, %v1840_v53  ;;  %v4658_v53 = vld [vmem:[%s5028_s25 + $0xe8] sm:$0xff]   ;;  %v1905_v17 = vsub.s32 2, %v5222_v13  ;;  %v5231_v20 = vld [vmem:[%s5018_s24] sm:$0xff] }
 0x69c   : > { %v1864_v24 = vmul.f32 %v4183_v16, %v1856_v22  ;;  %v5161_v26 = vadd.f32 %v4184_v23, %v1865_v21  ;;  %v5227_v16 = vsub.s32 0, %v5222_v13  ;;  %v1906_v28 = vrot.slane %v5231_v20, %v1905_v17 }
 0x69e   : > { %v5163_v27 = vadd.f32 %v4184_v23, %v1864_v24  ;;  %v1902_v23 = vrot.slane %v5231_v20, %v1901_v14  ;;  %v1910_v24 = vrot.slane %v5231_v20, %v1909_v15  ;;  %v1898_v25 = vrot.slane %v5231_v20, %v5227_v16 }
 0x6a0   : > { %v1874_v31 = vpack.c.bf16 %v5161_v26, %v5163_v27 }
 0x6a2   : > { %4201 = vmatmul.mubr.msk.bf16.vlgmr.msra.gmra.mxu0 %vm1088_vm3, %v1874_v31  ;;  %4202 = vmatmul.mubr.msk.bf16.vlgmr.msra.gmra.mxu1 %vm1088_vm3, %v1874_v31 }
 0x6a3   : > { %2159 = vmatpush1.bf16.msra.mxu0 %v4189_v4  ;;  %2202 = vmatpush1.bf16.msra.mxu1 %v4191_v7  ;;  %v4675_v4 = vld [vmem:[%s5028_s25 + $0x8] sm:$0xff]   ;;  %v4678_v7 = vld [vmem:[%s5028_s25 + $0xc0] sm:$0xff]  }
 0x6a4   : > { %2176 = vmatprep.mubr.bf16.mxu0 %v4810_v0  ;;  %2219 = vmatprep.mubr.bf16.mxu1 %v4810_v0 }
 0x6a5   : > { %2244 = vmatprep.subr.bf16.mxu0 %v4194_v32  ;;  %2287 = vmatprep.subr.bf16.mxu1 %v4196_v33  ;;  %v1917_v33 = vsub.s32 5, %v5222_v13 }
 0x6aa   : > { %4203 = vmatmul.mubr.msk.bf16.vlgmr.msra.gmra.mxu0 %vm1088_vm3, %v1874_v31  ;;  %4204 = vmatmul.mubr.msk.bf16.vlgmr.msra.gmra.mxu1 %vm1088_vm3, %v1874_v31 }
 0x6ab   : > { %2245 = vmatpush1.bf16.msra.mxu0 %v4193_v38  ;;  %2288 = vmatpush1.bf16.msra.mxu1 %v4195_v39 }
 0x6ac   : > { %2262 = vmatprep.mubr.bf16.mxu0 %v4810_v0  ;;  %2305 = vmatprep.mubr.bf16.mxu1 %v4810_v0 }
 0x6ad   : > { %2330 = vmatprep.subr.bf16.mxu0 %v4198_v40  ;;  %2373 = vmatprep.subr.bf16.mxu1 %v4200_v41 }
 0x6b2   : > { %4205 = vmatmul.mubr.msk.bf16.vlgmr.msra.gmra.mxu0 %vm1088_vm3, %v1874_v31  ;;  %4206 = vmatmul.mubr.msk.bf16.vlgmr.msra.gmra.mxu1 %vm1088_vm3, %v1874_v31 }
 0x6b3   : > { %2331 = vmatpush1.bf16.msra.mxu0 %v4197_v42  ;;  %2374 = vmatpush1.bf16.msra.mxu1 %v4199_v43 }
 0x6b4   : > { %2348 = vmatprep.mubr.bf16.mxu0 %v4810_v0  ;;  %2391 = vmatprep.mubr.bf16.mxu1 %v4810_v0  ;;  %v4671_v0 = vld [vmem:[%s5028_s25 + $0x10] sm:$0xff]  }
 0x6b5   : > { %4388 = vmatprep.subr.bf16.mxu0 %v4649_v44  ;;  %4410 = vmatprep.subr.bf16.mxu1 %v4650_v45 }
 0x6ba   : > { %4207 = vmatmul.mubr.msk.bf16.vlgmr.msra.gmra.mxu0 %vm1088_vm3, %v1874_v31  ;;  %4208 = vmatmul.mubr.msk.bf16.vlgmr.msra.gmra.mxu1 %vm1088_vm3, %v1874_v31 }
 0x6bb   : > { %4389 = vmatpush3.bf16.msra.mxu0 %v4651_v46  ;;  %4411 = vmatpush3.bf16.msra.mxu1 %v4652_v47 }
 0x6bc   : > { %4390 = vmatprep.subr.bf16.mxu0 %v4653_v48  ;;  %4412 = vmatprep.subr.bf16.mxu1 %v4654_v49  ;;  %v1918_v49 = vrot.slane %v5231_v20, %v1917_v33 }
 0x6bf   : > { %4391 = vmatpush3.bf16.msra.mxu0 %v4655_v50  ;;  %4413 = vmatpush3.bf16.msra.mxu1 %v4656_v51  ;;  %v1926_v50 = vrot.slane %v5231_v20, %v1925_v34 }
 0x6c0   : > { %4392 = vmatprep.subr.bf16.mxu0 %v4657_v52  ;;  %4414 = vmatprep.subr.bf16.mxu1 %v4658_v53 }
 0x6c3   : > { %4393 = vmatpush3.bf16.msra.mxu0 %v4659_v54  ;;  %4415 = vmatpush3.bf16.msra.mxu1 %v4660_v19 }
 0x6c4   : > { %4394 = vmatprep.subr.bf16.mxu0 %v4661_v55  ;;  %4416 = vmatprep.subr.bf16.mxu1 %v4662_v18 }
 0x6c7   : > { %4395 = vmatpush3.bf16.msra.mxu0 %v4663_v56  ;;  %4417 = vmatpush3.bf16.msra.mxu1 %v4664_v57 }
 0x6c8   : > { %4396 = vmatprep.subr.bf16.mxu0 %v4665_v58  ;;  %4418 = vmatprep.subr.bf16.mxu1 %v4666_v59  ;;  %v4683_v59 = vld [vmem:[%s5028_s25 + $0x138] sm:$0xff]  }
 0x6cb   : > { %4397 = vmatpush3.bf16.msra.mxu0 %v4667_v60  ;;  %4419 = vmatpush3.bf16.msra.mxu1 %v4668_v61  ;;  %v4684_v60 = vld [vmem:[%s5028_s25 + $0x1b8] sm:$0xff]  }
 0x6cc   : > { %4398 = vmatprep.subr.bf16.mxu0 %v4669_v62  ;;  %4420 = vmatprep.subr.bf16.mxu1 %v4670_v63 }
 0x6cf   : > { %4399 = vmatpush3.bf16.msra.mxu0 %v4671_v0  ;;  %4421 = vmatpush3.bf16.msra.mxu1 %v4672_v1  ;;  %v4685_v1 = vld [vmem:[%s5028_s25 + $0x170] sm:$0xff]  }
 0x6d0   : > { %4400 = vmatprep.subr.bf16.mxu0 %v4673_v2  ;;  %4422 = vmatprep.subr.bf16.mxu1 %v4674_v3  ;;  %v4686_v2 = vld [vmem:[%s5028_s25 + $0x1f0] sm:$0xff]  }
 0x6d3   : > { %4401 = vmatpush3.bf16.msra.mxu0 %v4675_v4  ;;  %4423 = vmatpush3.bf16.msra.mxu1 %v4676_v5 }
 0x6d4   : > { %4402 = vmatprep.subr.bf16.mxu0 %v4677_v6  ;;  %4424 = vmatprep.subr.bf16.mxu1 %v4678_v7 }
 0x6d7   : > { %4403 = vmatpush3.bf16.msra.mxu0 %v4679_v8  ;;  %4425 = vmatpush3.bf16.msra.mxu1 %v4680_v9  ;;  %v4687_v9 = vld [vmem:[%s5028_s25 + $0x130] sm:$0xff]  }
 0x6d8   : > { %4432 = vmatprep.subr.bf16.mxu0 %v4681_v10  ;;  %4454 = vmatprep.subr.bf16.mxu1 %v4682_v11  ;;  %v4688_v10 = vld [vmem:[%s5028_s25 + $0x1b0] sm:$0xff]   ;;  %v4689_v11 = vld [vmem:[%s5028_s25 + $0x168] sm:$0xff]  }
 0x762   : > { %v2092_v21 = vpop.f32.mrf.mxu0  ;;  %v2135_v22 = vpop.f32.mrf.mxu1 }
 0x763   : > { %v2093_v39 = vadd.f32 %v2092_v21, %v1898_v25  ;;  %v2136_v40 = vadd.f32 %v2135_v22, %v1906_v28 }
 0x764   : > { %v2094_v29 = vpop.f32.mrf.mxu0  ;;  %v2137_v30 = vpop.f32.mrf.mxu1 }
 0x765   : > { %v2095_v35 = vadd.f32 %v2094_v29, %v1902_v23  ;;  %v2138_v36 = vadd.f32 %v2137_v30, %v1910_v24  ;;  %v2402_v19 = vmax.f32 %v2093_v39, 0.0  ;;  %v2404_v55 = vmax.f32 %v2136_v40, 0.0  ;;  %v4691_v29 = vld [vmem:[%s5028_s25 + $0x128] sm:$0xff]   ;;  %v4697_v39 = vld [vmem:[%s5028_s25 + $0x158] sm:$0xff]  }
 0x766   : > { %v2096_v31 = vpop.f32.mrf.mxu0  ;;  %v2139_v32 = vpop.f32.mrf.mxu1  ;;  %v4692_v30 = vld [vmem:[%s5028_s25 + $0x1a8] sm:$0xff]   ;;  %v4698_v40 = vld [vmem:[%s5028_s25 + $0x1d8] sm:$0xff]  }
 0x767   : > { %v2097_v37 = vadd.f32 %v2096_v31, %v1898_v25  ;;  %v2140_v38 = vadd.f32 %v2139_v32, %v1906_v28  ;;  %v2403_v51 = vmax.f32 %v2095_v35, 0.0  ;;  %v2405_v52 = vmax.f32 %v2138_v36, 0.0  ;;  %v4693_v31 = vld [vmem:[%s5028_s25 + $0x160] sm:$0xff]  }
 0x768   : > { %v2098_v41 = vpop.f32.mrf.mxu0  ;;  %v2141_v42 = vpop.f32.mrf.mxu1  ;;  %v4694_v32 = vld [vmem:[%s5028_s25 + $0x1e0] sm:$0xff]  }
 0x769   : > { %v2099_v43 = vadd.f32 %v2098_v41, %v1902_v23  ;;  %v2142_v44 = vadd.f32 %v2141_v42, %v1910_v24  ;;  %v2418_v45 = vmax.f32 %v2097_v37, 0.0  ;;  %v2420_v46 = vmax.f32 %v2140_v38, 0.0  ;;  %v4690_v24 = vld [vmem:[%s5028_s25 + $0x1e8] sm:$0xff]   ;;  %v4695_v36 = vld [vmem:[%s5028_s25 + $0x120] sm:$0xff]   ;;  %v4699_v42 = vld [vmem:[%s5028_s25 + $0x118] sm:$0xff]  }
 0x76a   : > { %v5246_v47 = vpop.f32.mrf.mxu0  ;;  %v5248_v48 = vpop.f32.mrf.mxu1  ;;  %v4696_v38 = vld [vmem:[%s5028_s25 + $0x1a0] sm:$0xff]  }
 0x76b   : > { %v2419_v53 = vmax.f32 %v2099_v43, 0.0  ;;  %v2421_v54 = vmax.f32 %v2142_v44, 0.0  ;;  %v2434_v61 = vpack.c.bf16 %v2418_v45, %v2402_v19  ;;  %v2436_v62 = vpack.c.bf16 %v2420_v46, %v2404_v55  ;;  %v4700_v44 = vld [vmem:[%s5028_s25 + $0x198] sm:$0xff]   ;;  %v4701_v45 = vld [vmem:[%s5028_s25 + $0x150] sm:$0xff]   ;;  %v4705_v19 = vld [vmem:[%s5028_s25 + $0x148] sm:$0xff]  }
 0x76c   : > { %v2180_v18 = vpop.f32.mrf.mxu0  ;;  %v2223_v56 = vpop.f32.mrf.mxu1  ;;  %v4702_v46 = vld [vmem:[%s5028_s25 + $0x1d0] sm:$0xff]   ;;  %v4706_v55 = vld [vmem:[%s5028_s25 + $0x1c8] sm:$0xff]  }
 0x76d   : > { %v2435_v57 = vpack.c.bf16 %v2419_v53, %v2403_v51  ;;  %v2437_v58 = vpack.c.bf16 %v2421_v54, %v2405_v52  ;;  %v2181_v3 = vadd.f32 %v2180_v18, %v1918_v49  ;;  %v2224_v4 = vadd.f32 %v2223_v56, %v1926_v50  ;;  %v4703_v52 = vld [vmem:[%s5028_s25 + $0x110] sm:$0xff]  }
 0x76e   : > { %v5258_v63 = vpop.f32.mrf.mxu0  ;;  %v5260_v0 = vpop.f32.mrf.mxu1  ;;  %v4704_v54 = vld [vmem:[%s5028_s25 + $0x190] sm:$0xff]  }
 0x76f   : > { %3513 = vmatprep.mubr.bf16.mxu0 %v2435_v57  ;;  %3554 = vmatprep.mubr.bf16.mxu1 %v2437_v58  ;;  %v2407_v12 = vmax.f32 %v2181_v3, 0.0  ;;  %v2409_v21 = vmax.f32 %v2224_v4, 0.0  ;;  %v5301_v57 = vld [vmem:[%s5018_s24 + $0x8] sm:$0xff] }
 0x770   : > { %v2184_v5 = vpop.f32.mrf.mxu0  ;;  %v2227_v6 = vpop.f32.mrf.mxu1  ;;  %3514 = vmatmul.mubr.bf16.vlgmr.msra.gmra.mxu0 %v2434_v61  ;;  %3555 = vmatmul.mubr.bf16.vlgmr.msra.gmra.mxu1 %v2436_v62  ;;  %v1934_v61 = vrot.slane %v5301_v57, %v1901_v14  ;;  %v1942_v3 = vrot.slane %v5301_v57, %v1909_v15 }
 0x771   : > { %v2185_v7 = vadd.f32 %v2184_v5, %v1918_v49  ;;  %v2228_v8 = vadd.f32 %v2227_v6, %v1926_v50  ;;  %4433 = vmatpush3.bf16.msra.mxu0 %v4683_v59  ;;  %4455 = vmatpush3.bf16.msra.mxu1 %v4684_v60  ;;  %v1913_v49 = vsub.s32 4, %v5222_v13  ;;  %v1921_v50 = vsub.s32 6, %v5222_v13  ;;  %v4707_v59 = vld [vmem:[%s5028_s25 + $0x108] sm:$0xff]   ;;  %v4775_v13 = vld [vmem:[%s5028_s25 + $0x300] sm:$0xff]  }
 0x772   : > { %4434 = vmatprep.subr.bf16.mxu0 %v4685_v1  ;;  %4456 = vmatprep.subr.bf16.mxu1 %v4686_v2  ;;  %v5272_v35 = vpop.f32.mrf.mxu0  ;;  %v5275_v37 = vpop.f32.mrf.mxu1  ;;  %v4708_v1 = vld [vmem:[%s5028_s25 + $0x188] sm:$0xff]   ;;  %v4709_v2 = vld [vmem:[%s5028_s25 + $0x140] sm:$0xff]  }
 0x773   : > { %v2423_v22 = vmax.f32 %v2185_v7, 0.0  ;;  %v2425_v23 = vmax.f32 %v2228_v8, 0.0  ;;  %v1914_v18 = vrot.slane %v5231_v20, %v1913_v49  ;;  %v1922_v56 = vrot.slane %v5231_v20, %v1921_v50  ;;  %v4711_v7 = vld [vmem:[%s5028_s25 + $0x100] sm:$0xff]  }
 0x774   : > { %v2266_v41 = vpop.f32.mrf.mxu0  ;;  %v2309_v43 = vpop.f32.mrf.mxu1 }
 0x775   : > { %v2439_v25 = vpack.c.bf16 %v2423_v22, %v2407_v12  ;;  %v2441_v28 = vpack.c.bf16 %v2425_v23, %v2409_v21  ;;  %4435 = vmatpush3.bf16.msra.mxu0 %v4687_v9  ;;  %4457 = vmatpush3.bf16.msra.mxu1 %v4688_v10  ;;  %v2183_v60 = vadd.f32 %v5258_v63, %v1914_v18  ;;  %v4710_v63 = vld [vmem:[%s5028_s25 + $0x1c0] sm:$0xff]   ;;  %v4713_v10 = vld [vmem:[%s5028_s25 + $0x278] sm:$0xff]  }
 0x776   : > { %4436 = vmatprep.subr.bf16.mxu0 %v4689_v11  ;;  %4458 = vmatprep.subr.bf16.mxu1 %v4690_v24  ;;  %v5286_v51 = vpop.f32.mrf.mxu0  ;;  %v5289_v53 = vpop.f32.mrf.mxu1  ;;  %v2226_v20 = vadd.f32 %v5260_v0, %v1922_v56  ;;  %v2179_v4 = vadd.f32 %v5246_v47, %v1914_v18  ;;  %v2222_v14 = vadd.f32 %v5248_v48, %v1922_v56  ;;  %v4712_v0 = vld [vmem:[%s5028_s25 + $0x180] sm:$0xff]   ;;  %v4714_v12 = vld [vmem:[%s5028_s25 + $0x2f8] sm:$0xff]  }
 0x777   : > { %3595 = vmatprep.mubr.bf16.mxu0 %v2439_v25  ;;  %3636 = vmatprep.mubr.bf16.mxu1 %v2441_v28  ;;  %v2422_v8 = vmax.f32 %v2183_v60, 0.0  ;;  %v2267_v9 = vadd.f32 %v2266_v41, %v1934_v61  ;;  %v2310_v11 = vadd.f32 %v2309_v43, %v1942_v3  ;;  %v4715_v23 = vld [vmem:[%s5028_s25 + $0x238] sm:$0xff]   ;;  %v4721_v41 = vld [vmem:[%s5028_s25 + $0x268] sm:$0xff]  }
 0x778   : > { %v2270_v58 = vpop.f32.mrf.mxu0  ;;  %v2313_v62 = vpop.f32.mrf.mxu1  ;;  %v2424_v15 = vmax.f32 %v2226_v20, 0.0  ;;  %v2406_v47 = vmax.f32 %v2179_v4, 0.0  ;;  %v2408_v48 = vmax.f32 %v2222_v14, 0.0  ;;  %v4716_v28 = vld [vmem:[%s5028_s25 + $0x2b8] sm:$0xff]   ;;  %v4723_v43 = vld [vmem:[%s5028_s25 + $0x228] sm:$0xff]   ;;  %v4735_v20 = vld [vmem:[%s5028_s25 + $0x210] sm:$0xff]   ;;  %v1930_v14 = vrot.slane %v5301_v57, %v5227_v16 }
 0x779   : > { %4437 = vmatpush3.bf16.msra.mxu0 %v4691_v29  ;;  %4459 = vmatpush3.bf16.msra.mxu1 %v4692_v30  ;;  %v2271_v5 = vadd.f32 %v2270_v58, %v1934_v61  ;;  %v2314_v6 = vadd.f32 %v2313_v62, %v1942_v3  ;;  %v2411_v25 = vmax.f32 %v2267_v9, 0.0  ;;  %v2413_v30 = vmax.f32 %v2310_v11, 0.0  ;;  %v4729_v18 = vld [vmem:[%s5028_s25 + $0x258] sm:$0xff]   ;;  %v4733_v62 = vld [vmem:[%s5028_s25 + $0x250] sm:$0xff]   ;;  %v4737_v4 = vld [vmem:[%s5028_s25 + $0x248] sm:$0xff]  }
 0x77a   : > { %4438 = vmatprep.subr.bf16.mxu0 %v4693_v31  ;;  %4460 = vmatprep.subr.bf16.mxu1 %v4694_v32  ;;  %v2438_v24 = vpack.c.bf16 %v2422_v8, %v2406_v47  ;;  %v2440_v29 = vpack.c.bf16 %v2424_v15, %v2408_v48  ;;  %v4717_v31 = vld [vmem:[%s5028_s25 + $0x270] sm:$0xff]   ;;  %v4730_v56 = vld [vmem:[%s5028_s25 + $0x2d8] sm:$0xff]   ;;  %v4739_v8 = vld [vmem:[%s5028_s25 + $0x208] sm:$0xff]   ;;  %v2269_v9 = vadd.f32 %v5286_v51, %v1930_v14 }
 0x77b   : > { %v2427_v21 = vmax.f32 %v2271_v5, 0.0  ;;  %v2429_v22 = vmax.f32 %v2314_v6, 0.0  ;;  %v4732_v61 = vld [vmem:[%s5028_s25 + $0x298] sm:$0xff]   ;;  %v4738_v5 = vld [vmem:[%s5028_s25 + $0x2c8] sm:$0xff]   ;;  %v1938_v6 = vrot.slane %v5301_v57, %v1905_v17  ;;  %v4741_v11 = vld [vmem:[%s5028_s25 + $0x240] sm:$0xff]   ;;  %v1958_v17 = vrot.slane %v5301_v57, %v1925_v34 }
 0x77c   : > { %v4740_v15 = vld [vmem:[%s5028_s25 + $0x288] sm:$0xff]   ;;  %v4742_v51 = vld [vmem:[%s5028_s25 + $0x2c0] sm:$0xff]   ;;  %v2265_v47 = vadd.f32 %v5272_v35, %v1930_v14  ;;  %v4766_v14 = vld [vmem:[%s5028_s25 + $0x3d0] sm:$0xff]  }
 0x77d   : > { %4439 = vmatpush3.bf16.msra.mxu0 %v4695_v36  ;;  %4461 = vmatpush3.bf16.msra.mxu1 %v4696_v38  ;;  %v2443_v32 = vpack.c.bf16 %v2427_v21, %v2411_v25  ;;  %v4718_v36 = vld [vmem:[%s5028_s25 + $0x2f0] sm:$0xff]   ;;  %v2445_v38 = vpack.c.bf16 %v2429_v22, %v2413_v30  ;;  %v4743_v22 = vld [vmem:[%s5028_s25 + $0x200] sm:$0xff]   ;;  %v4745_v25 = vld [vmem:[%s5028_s25 + $0x378] sm:$0xff]  }
 0x77e   : > { %4440 = vmatprep.subr.bf16.mxu0 %v4697_v39  ;;  %4462 = vmatprep.subr.bf16.mxu1 %v4698_v40  ;;  %v4719_v39 = vld [vmem:[%s5028_s25 + $0x230] sm:$0xff]   ;;  %v2410_v35 = vmax.f32 %v2265_v47, 0.0  ;;  %v4774_v47 = vld [vmem:[%s5028_s25 + $0x3c0] sm:$0xff]  }
 0x77f   : > { %v4720_v40 = vld [vmem:[%s5028_s25 + $0x2b0] sm:$0xff]  }
 0x781   : > { %4441 = vmatpush3.bf16.msra.mxu0 %v4699_v42  ;;  %4463 = vmatpush3.bf16.msra.mxu1 %v4700_v44  ;;  %v4722_v42 = vld [vmem:[%s5028_s25 + $0x2e8] sm:$0xff]  }
 0x782   : > { %4442 = vmatprep.subr.bf16.mxu0 %v4701_v45  ;;  %4464 = vmatprep.subr.bf16.mxu1 %v4702_v46  ;;  %v4724_v44 = vld [vmem:[%s5028_s25 + $0x2a8] sm:$0xff]   ;;  %v4725_v45 = vld [vmem:[%s5028_s25 + $0x260] sm:$0xff]  }
 0x783   : > { %v4726_v46 = vld [vmem:[%s5028_s25 + $0x2e0] sm:$0xff]  }
 0x785   : > { %4443 = vmatpush3.bf16.msra.mxu0 %v4703_v52  ;;  %4465 = vmatpush3.bf16.msra.mxu1 %v4704_v54  ;;  %v5333_v52 = vpop.f32.mrf.mxu0  ;;  %v4727_v54 = vld [vmem:[%s5028_s25 + $0x220] sm:$0xff]  }
 0x786   : > { %4444 = vmatprep.subr.bf16.mxu0 %v4705_v19  ;;  %4466 = vmatprep.subr.bf16.mxu1 %v4706_v55  ;;  %v5336_v19 = vpop.f32.mrf.mxu1  ;;  %v4728_v55 = vld [vmem:[%s5028_s25 + $0x2a0] sm:$0xff]  }
 0x787   : > { %v2352_v58 = vpop.f32.mrf.mxu0 }
 0x788   : > { %v2395_v60 = vpop.f32.mrf.mxu1 }
 0x789   : > { %4445 = vmatpush3.bf16.msra.mxu0 %v4707_v59  ;;  %4467 = vmatpush3.bf16.msra.mxu1 %v4708_v1  ;;  %v4731_v59 = vld [vmem:[%s5028_s25 + $0x218] sm:$0xff]   ;;  %v4734_v1 = vld [vmem:[%s5028_s25 + $0x2d0] sm:$0xff]  }
 0x78a   : > { %4446 = vmatprep.subr.bf16.mxu0 %v4709_v2  ;;  %4468 = vmatprep.subr.bf16.mxu1 %v4710_v63  ;;  %v5345_v2 = vpop.f32.mrf.mxu0  ;;  %v5348_v3 = vpop.f32.mrf.mxu1  ;;  %v4736_v63 = vld [vmem:[%s5028_s25 + $0x290] sm:$0xff]  }
 0x78d   : > { %4447 = vmatpush3.bf16.msra.mxu0 %v4711_v7  ;;  %4469 = vmatpush3.bf16.msra.mxu1 %v4712_v0  ;;  %v2356_v7 = vpop.f32.mrf.mxu0  ;;  %v1950_v0 = vrot.slane %v5301_v57, %v1917_v33  ;;  %v2308_v33 = vadd.f32 %v5275_v37, %v1938_v6 }
 0x78e   : > { %4476 = vmatprep.subr.bf16.mxu0 %v4713_v10  ;;  %4498 = vmatprep.subr.bf16.mxu1 %v4714_v12  ;;  %v2399_v10 = vpop.f32.mrf.mxu1  ;;  %v2312_v12 = vadd.f32 %v5289_v53, %v1938_v6  ;;  %v4744_v53 = vld [vmem:[%s5028_s25 + $0x280] sm:$0xff]   ;;  %v4767_v6 = vld [vmem:[%s5028_s25 + $0x310] sm:$0xff]  }
 0x78f   : > { %v2357_v21 = vadd.f32 %v2356_v7, %v1950_v0  ;;  %v2400_v48 = vadd.f32 %v2399_v10, %v1958_v17  ;;  %v2412_v37 = vmax.f32 %v2308_v33, 0.0  ;;  %v4768_v7 = vld [vmem:[%s5028_s25 + $0x390] sm:$0xff]   ;;  %v1954_v10 = vrot.slane %v5301_v57, %v1921_v50 }
 0x790   : > { %3596 = vmatmul.mubr.bf16.vlgmr.msra.gmra.mxu0 %v2438_v24  ;;  %3637 = vmatmul.mubr.bf16.vlgmr.msra.gmra.mxu1 %v2440_v29  ;;  %v2353_v24 = vadd.f32 %v2352_v58, %v1950_v0  ;;  %v2428_v34 = vmax.f32 %v2312_v12, 0.0  ;;  %v4746_v29 = vld [vmem:[%s5028_s25 + $0x3f8] sm:$0xff]   ;;  %v4756_v58 = vld [vmem:[%s5028_s25 + $0x3a8] sm:$0xff]   ;;  %v1946_v0 = vrot.slane %v5301_v57, %v1913_v49  ;;  %v4776_v57 = vld [vmem:[%s5028_s25 + $0x380] sm:$0xff]  }
 0x791   : > { %4477 = vmatpush3.bf16.msra.mxu0 %v4715_v23  ;;  %3677 = vmatprep.mubr.bf16.mxu0 %v2443_v32  ;;  %v2426_v23 = vmax.f32 %v2269_v9, 0.0  ;;  %v2431_v30 = vmax.f32 %v2357_v21, 0.0  ;;  %v4747_v32 = vld [vmem:[%s5028_s25 + $0x338] sm:$0xff]   ;;  %v4770_v9 = vld [vmem:[%s5028_s25 + $0x3c8] sm:$0xff]   ;;  %v2394_v49 = vadd.f32 %v5336_v19, %v1954_v10 }
 0x792   : > { %4499 = vmatpush3.bf16.msra.mxu1 %v4716_v28  ;;  %3718 = vmatprep.mubr.bf16.mxu1 %v2445_v38  ;;  %v2396_v28 = vadd.f32 %v2395_v60, %v1958_v17  ;;  %v2415_v38 = vmax.f32 %v2353_v24, 0.0  ;;  %v4758_v60 = vld [vmem:[%s5028_s25 + $0x3e0] sm:$0xff]   ;;  %v4772_v12 = vld [vmem:[%s5028_s25 + $0x388] sm:$0xff]   ;;  %v2351_v21 = vadd.f32 %v5333_v52, %v1946_v0 }
 0x793   : > { %4478 = vmatprep.subr.bf16.mxu0 %v4717_v31  ;;  %4500 = vmatprep.subr.bf16.mxu1 %v4718_v36  ;;  %v2433_v31 = vmax.f32 %v2400_v48, 0.0  ;;  %v2442_v36 = vpack.c.bf16 %v2426_v23, %v2410_v35  ;;  %v4773_v17 = vld [vmem:[%s5028_s25 + $0x340] sm:$0xff]   ;;  %v2416_v48 = vmax.f32 %v2394_v49, 0.0 }
 0x795   : > { %4479 = vmatpush3.bf16.msra.mxu0 %v4719_v39  ;;  %v4748_v39 = vld [vmem:[%s5028_s25 + $0x3b8] sm:$0xff]  }
 0x796   : > { %4501 = vmatpush3.bf16.msra.mxu1 %v4720_v40  ;;  %4480 = vmatprep.subr.bf16.mxu0 %v4721_v41  ;;  %v2444_v40 = vpack.c.bf16 %v2428_v34, %v2412_v37  ;;  %v2417_v41 = vmax.f32 %v2396_v28, 0.0 }
 0x797   : > { %4502 = vmatprep.subr.bf16.mxu1 %v4722_v42  ;;  %v4749_v42 = vld [vmem:[%s5028_s25 + $0x370] sm:$0xff]  }
 0x799   : > { %4481 = vmatpush3.bf16.msra.mxu0 %v4723_v43  ;;  %v2447_v43 = vpack.c.bf16 %v2431_v30, %v2415_v38 }
 0x79a   : > { %4503 = vmatpush3.bf16.msra.mxu1 %v4724_v44  ;;  %4482 = vmatprep.subr.bf16.mxu0 %v4725_v45  ;;  %v4750_v44 = vld [vmem:[%s5028_s25 + $0x3f0] sm:$0xff]   ;;  %v2449_v45 = vpack.c.bf16 %v2433_v31, %v2417_v41 }
 0x79b   : > { %4504 = vmatprep.subr.bf16.mxu1 %v4726_v46  ;;  %v4751_v46 = vld [vmem:[%s5028_s25 + $0x330] sm:$0xff]  }
 0x79d   : > { %4483 = vmatpush3.bf16.msra.mxu0 %v4727_v54  ;;  %v4752_v54 = vld [vmem:[%s5028_s25 + $0x3b0] sm:$0xff]  }
 0x79e   : > { %4505 = vmatpush3.bf16.msra.mxu1 %v4728_v55  ;;  %4484 = vmatprep.subr.bf16.mxu0 %v4729_v18  ;;  %v4753_v55 = vld [vmem:[%s5028_s25 + $0x368] sm:$0xff]  }
 0x79f   : > { %4506 = vmatprep.subr.bf16.mxu1 %v4730_v56  ;;  %v4754_v18 = vld [vmem:[%s5028_s25 + $0x3e8] sm:$0xff]  }
 0x7a0   : > { %v4755_v56 = vld [vmem:[%s5028_s25 + $0x328] sm:$0xff]  }
 0x7a1   : > { %4485 = vmatpush3.bf16.msra.mxu0 %v4731_v59  ;;  %v4757_v59 = vld [vmem:[%s5028_s25 + $0x360] sm:$0xff]  }
 0x7a2   : > { %4507 = vmatpush3.bf16.msra.mxu1 %v4732_v61  ;;  %4486 = vmatprep.subr.bf16.mxu0 %v4733_v62  ;;  %v4759_v61 = vld [vmem:[%s5028_s25 + $0x320] sm:$0xff]  }
 0x7a3   : > { %4508 = vmatprep.subr.bf16.mxu1 %v4734_v1  ;;  %v4760_v62 = vld [vmem:[%s5028_s25 + $0x3a0] sm:$0xff]   ;;  %v4761_v1 = vld [vmem:[%s5028_s25 + $0x358] sm:$0xff]  }
 0x7a5   : > { %4487 = vmatpush3.bf16.msra.mxu0 %v4735_v20  ;;  %v4762_v20 = vld [vmem:[%s5028_s25 + $0x3d8] sm:$0xff]  }
 0x7a6   : > { %4509 = vmatpush3.bf16.msra.mxu1 %v4736_v63  ;;  %4488 = vmatprep.subr.bf16.mxu0 %v4737_v4  ;;  %v4763_v63 = vld [vmem:[%s5028_s25 + $0x318] sm:$0xff]  }
 0x7a7   : > { %4510 = vmatprep.subr.bf16.mxu1 %v4738_v5  ;;  %v4764_v4 = vld [vmem:[%s5028_s25 + $0x398] sm:$0xff]   ;;  %v4765_v5 = vld [vmem:[%s5028_s25 + $0x350] sm:$0xff]  }
 0x7a9   : > { %4489 = vmatpush3.bf16.msra.mxu0 %v4739_v8  ;;  %v4769_v8 = vld [vmem:[%s5028_s25 + $0x348] sm:$0xff]  }
 0x7aa   : > { %4511 = vmatpush3.bf16.msra.mxu1 %v4740_v15  ;;  %4490 = vmatprep.subr.bf16.mxu0 %v4741_v11  ;;  %v4771_v15 = vld [vmem:[%s5028_s25 + $0x308] sm:$0xff]   ;;  %v2355_v11 = vadd.f32 %v5345_v2, %v1946_v0  ;;  %v2414_v2 = vmax.f32 %v2351_v21, 0.0 }
 0x7ab   : > { %4512 = vmatprep.subr.bf16.mxu1 %v4742_v51  ;;  %v2398_v51 = vadd.f32 %v5348_v3, %v1954_v10 }
 0x7ac   : > { %v2430_v50 = vmax.f32 %v2355_v11, 0.0 }
 0x7ad   : > { %4491 = vmatpush3.bf16.msra.mxu0 %v4743_v22  ;;  %v2432_v33 = vmax.f32 %v2398_v51, 0.0 }
 0x7ae   : > { %4513 = vmatpush3.bf16.msra.mxu1 %v4744_v53  ;;  %4520 = vmatprep.subr.bf16.mxu0 %v4745_v25  ;;  %v2446_v22 = vpack.c.bf16 %v2430_v50, %v2414_v2 }
 0x7af   : > { %4542 = vmatprep.subr.bf16.mxu1 %v4746_v29  ;;  %v2448_v3 = vpack.c.bf16 %v2432_v33, %v2416_v48 }
 0x7b0   : > { %3678 = vmatmul.mubr.bf16.vlgmr.msra.gmra.mxu0 %v2442_v36 }
 0x7b1   : > { %3719 = vmatmul.mubr.bf16.vlgmr.msra.gmra.mxu1 %v2444_v40  ;;  %4521 = vmatpush3.bf16.msra.mxu0 %v4747_v32 }
 0x7b2   : > { %3759 = vmatprep.mubr.bf16.mxu0 %v2447_v43  ;;  %4543 = vmatpush3.bf16.msra.mxu1 %v4748_v39  ;;  %v4209_v39 = vld [vmem:[%s967_s11] ss:$0 sm:$0xff] }
 0x7b3   : > { %3800 = vmatprep.mubr.bf16.mxu1 %v2449_v45  ;;  %4522 = vmatprep.subr.bf16.mxu0 %v4749_v42 }
 0x7b4   : > { %4544 = vmatprep.subr.bf16.mxu1 %v4750_v44 }
 0x7b5   : > { %4523 = vmatpush3.bf16.msra.mxu0 %v4751_v46 }
 0x7b6   : > { %4545 = vmatpush3.bf16.msra.mxu1 %v4752_v54  ;;  %4524 = vmatprep.subr.bf16.mxu0 %v4753_v55 }
 0x7b7   : > { %4546 = vmatprep.subr.bf16.mxu1 %v4754_v18 }
 0x7b9   : > { %4525 = vmatpush3.bf16.msra.mxu0 %v4755_v56 }
 0x7ba   : > { %4547 = vmatpush3.bf16.msra.mxu1 %v4756_v58  ;;  %4526 = vmatprep.subr.bf16.mxu0 %v4757_v59 }
 0x7bb   : > { %4548 = vmatprep.subr.bf16.mxu1 %v4758_v60 }
 0x7bd   : > { %4527 = vmatpush3.bf16.msra.mxu0 %v4759_v61 }
 0x7be   : > { %4549 = vmatpush3.bf16.msra.mxu1 %v4760_v62  ;;  %4528 = vmatprep.subr.bf16.mxu0 %v4761_v1 }
 0x7bf   : > { %4550 = vmatprep.subr.bf16.mxu1 %v4762_v20 }
 0x7c1   : > { %4529 = vmatpush3.bf16.msra.mxu0 %v4763_v63 }
 0x7c2   : > { %4551 = vmatpush3.bf16.msra.mxu1 %v4764_v4  ;;  %4530 = vmatprep.subr.bf16.mxu0 %v4765_v5 }
 0x7c3   : > { %4552 = vmatprep.subr.bf16.mxu1 %v4766_v14 }
 0x7c5   : > { %4531 = vmatpush3.bf16.msra.mxu0 %v4767_v6 }
 0x7c6   : > { %4553 = vmatpush3.bf16.msra.mxu1 %v4768_v7  ;;  %4532 = vmatprep.subr.bf16.mxu0 %v4769_v8 }
 0x7c7   : > { %4554 = vmatprep.subr.bf16.mxu1 %v4770_v9 }
 0x7c9   : > { %4533 = vmatpush3.bf16.msra.mxu0 %v4771_v15 }
 0x7ca   : > { %4555 = vmatpush3.bf16.msra.mxu1 %v4772_v12  ;;  %4534 = vmatprep.subr.bf16.mxu0 %v4773_v17 }
 0x7cb   : > { %4556 = vmatprep.subr.bf16.mxu1 %v4774_v47 }
 0x7cd   : > { %4535 = vmatpush3.bf16.msra.mxu0 %v4775_v13 }
 0x7ce   : > { %4557 = vmatpush3.bf16.msra.mxu1 %v4776_v57 }
 0x7d0   : > { %3760 = vmatmul.mubr.bf16.vlgmr.msra.gmra.mxu0 %v2446_v22 }
 0x7d1   : > { %3801 = vmatmul.mubr.bf16.vlgmr.msra.gmra.mxu1 %v2448_v3 }
 0x830   : > { %v4404_v23 = vpop.f32.mrf.mxu0  ;;  %v4426_v52 = vpop.f32.mrf.mxu1 }
 0x832   : > { %v4405_v19 = vpop.f32.mrf.mxu0  ;;  %v4427_v24 = vpop.f32.mrf.mxu1 }
 0x833   : > { %v4406_v38 = vadd.f32 %v4405_v19, %v4404_v23  ;;  %v4428_v46 = vadd.f32 %v4427_v24, %v4426_v52 }
 0x834   : > { %v4407_v53 = vpop.f32.mrf.mxu0  ;;  %v4429_v25 = vpop.f32.mrf.mxu1 }
 0x835   : > { %v3516_v42 = vadd.f32 %v4406_v38, %v4209_v39 }
 0x836   : > { %v4408_v34 = vpop.f32.mrf.mxu0  ;;  %v4430_v29 = vpop.f32.mrf.mxu1 }
 0x837   : > { %v4409_v43 = vadd.f32 %v4408_v34, %v4407_v53  ;;  %v3557_v55 = vadd.f32 %v4428_v46, %v3516_v42  ;;  %v4431_v59 = vadd.f32 %v4430_v29, %v4429_v25  ;;  %v4338_v46 = vld [vmem:[%s5528_s8] ss:$0 sm:$0xff] }
 0x839   : > { %v3519_v18 = vadd.f32 %v4409_v43, %v4209_v39 }
 0x83b   : > { %v3560_v62 = vadd.f32 %v4431_v59, %v3519_v18 }
 0x850   : > { %v4448_v28 = vpop.f32.mrf.mxu0  ;;  %v4470_v35 = vpop.f32.mrf.mxu1 }
 0x852   : > { %v4449_v30 = vpop.f32.mrf.mxu0  ;;  %v4471_v37 = vpop.f32.mrf.mxu1 }
 0x853   : > { %v4450_v54 = vadd.f32 %v4449_v30, %v4448_v28  ;;  %v4472_v1 = vadd.f32 %v4471_v37, %v4470_v35 }
 0x854   : > { %v4451_v31 = vpop.f32.mrf.mxu0  ;;  %v4473_v32 = vpop.f32.mrf.mxu1 }
 0x855   : > { %v3598_v60 = vadd.f32 %v4450_v54, %v3557_v55  ;;  %v4339_v55 = vld [vmem:[%s5529_s9] ss:$0 sm:$0xff] }
 0x856   : > { %v4452_v36 = vpop.f32.mrf.mxu0  ;;  %v4474_v41 = vpop.f32.mrf.mxu1 }
 0x857   : > { %v4453_v61 = vadd.f32 %v4452_v36, %v4451_v31  ;;  %v3639_v5 = vadd.f32 %v4472_v1, %v3598_v60  ;;  %v4475_v6 = vadd.f32 %v4474_v41, %v4473_v32 }
 0x859   : > { %v3601_v14 = vadd.f32 %v4453_v61, %v3560_v62 }
 0x85b   : > { %v3642_v10 = vadd.f32 %v4475_v6, %v3601_v14 }
 0x870   : > { %v4492_v40 = vpop.f32.mrf.mxu0 }
 0x871   : > { %v4514_v44 = vpop.f32.mrf.mxu1 }
 0x872   : > { %v4493_v45 = vpop.f32.mrf.mxu0 }
 0x873   : > { %v4515_v56 = vpop.f32.mrf.mxu1  ;;  %v4494_v20 = vadd.f32 %v4493_v45, %v4492_v40 }
 0x874   : > { %v4495_v58 = vpop.f32.mrf.mxu0  ;;  %v4516_v15 = vadd.f32 %v4515_v56, %v4514_v44 }
 0x875   : > { %v4517_v63 = vpop.f32.mrf.mxu1  ;;  %v3680_v7 = vadd.f32 %v4494_v20, %v3639_v5 }
 0x876   : > { %v4496_v4 = vpop.f32.mrf.mxu0 }
 0x877   : > { %v4497_v8 = vadd.f32 %v4496_v4, %v4495_v58  ;;  %v4518_v9 = vpop.f32.mrf.mxu1  ;;  %v3721_v17 = vadd.f32 %v4516_v15, %v3680_v7 }
 0x878   : > { %v4519_v13 = vadd.f32 %v4518_v9, %v4517_v63 }
 0x879   : > { %v3683_v51 = vadd.f32 %v4497_v8, %v3642_v10 }
 0x87b   : > { %v3724_v48 = vadd.f32 %v4519_v13, %v3683_v51 }
 0x890   : > { %v4536_v0 = vpop.f32.mrf.mxu0 }
 0x891   : > { %v4558_v11 = vpop.f32.mrf.mxu1 }
 0x892   : > { %v4537_v12 = vpop.f32.mrf.mxu0 }
 0x893   : > { %v4538_v47 = vadd.f32 %v4537_v12, %v4536_v0  ;;  %v4559_v21 = vpop.f32.mrf.mxu1 }
 0x894   : > { %v4539_v49 = vpop.f32.mrf.mxu0  ;;  %v4560_v57 = vadd.f32 %v4559_v21, %v4558_v11 }
 0x895   : > { %v3762_v50 = vadd.f32 %v4538_v47, %v3721_v17  ;;  %v4561_v33 = vpop.f32.mrf.mxu1 }
 0x896   : > { %v4540_v2 = vpop.f32.mrf.mxu0 }
 0x897   : > { %v3803_v22 = vadd.f32 %v4560_v57, %v3762_v50  ;;  %v4541_v3 = vadd.f32 %v4540_v2, %v4539_v49  ;;  %v4562_v23 = vpop.f32.mrf.mxu1 }
 0x898   : > { %v4563_v19 = vadd.f32 %v4562_v23, %v4561_v33 }
 0x899   : > { %v3765_v52 = vadd.f32 %v4541_v3, %v3724_v48  ;;  %v3809_v24 = vadd.f32 %v3803_v22, %v5163_v27 }
 0x89b   : > { %v3806_v53 = vadd.f32 %v4563_v19, %v3765_v52  ;;  %v3813_v25 = vsel %vm1088_vm3, %v3809_v24, 0.0 }
 0x89c   : > { %3814 = vadd.xlane.f32.xlu0 %v3813_v25 }
 0x89d   : > { %v3810_v34 = vadd.f32 %v3806_v53, %v5161_v26 }
 0x89f   : > { %v3816_v28 = vsel %vm1088_vm3, %v3810_v34, 0.0 }
 0x8a0   : > { %3817 = vadd.xlane.f32.xlu1 %v3816_v28 }
 0x925   : > { %v3815_v29 = vpop.xlane.xlu0 %3814 }
 0x926   : > { %v3819_v35 = vmul.f32 0.0625, %v3815_v29 }
 0x928   : > { %v3821_v30 = vsub.f32 %v3809_v24, %v3819_v35 }
 0x929   : > { %v3818_v37 = vpop.xlane.xlu1 %3817 }
 0x92a   : > { %v3820_v31 = vmul.f32 0.0625, %v3818_v37  ;;  %v3823_v32 = vmul.f32 %v3821_v30, %v3821_v30 }
 0x92c   : > { %v3822_v36 = vsub.f32 %v3810_v34, %v3820_v31  ;;  %v3825_v38 = vsel %vm1088_vm3, %v3823_v32, 0.0 }
 0x92d   : > { %3826 = vadd.xlane.f32.xlu0 %v3825_v38 }
 0x92e   : > { %v3824_v27 = vmul.f32 %v3822_v36, %v3822_v36 }
 0x930   : > { %v3828_v39 = vsel %vm1088_vm3, %v3824_v27, 0.0 }
 0x931   : > { %3829 = vadd.xlane.f32.xlu1 %v3828_v39 }
 0x9b6   : > { %v3827_v26 = vpop.xlane.xlu0 %3826 }
 0x9b7   : > { %v3831_v40 = vmul.f32 0.0625, %v3827_v26 }
 0x9b9   : > { %v3833_v41 = vadd.f32 1e-05, %v3831_v40 }
 0x9ba   : > { %v3830_v42 = vpop.xlane.xlu1 %3829 }
 0x9bb   : > { %4797 = vrsqrt.f32 %v3833_v41  ;;  %v3832_v43 = vmul.f32 0.0625, %v3830_v42 }
 0x9bd   : > { %v3834_v44 = vadd.f32 1e-05, %v3832_v43 }
 0x9bf   : > { %4799 = vrsqrt.f32 %v3834_v44 }
 0x9c8   : > { %v4798_v45 = vpop.eup %4797 }
 0x9c9   : > { %v3837_v54 = vmul.f32 %v4798_v45, %v3821_v30 }
 0x9cb   : > { %v3845_v18 = vmul.f32 %v4338_v46, %v3837_v54 }
 0x9cc   : > { %v4800_v56 = vpop.eup %4799 }
 0x9cd   : > { %v3853_v58 = vadd.f32 %v4339_v55, %v3845_v18  ;;  %v3838_v59 = vmul.f32 %v4800_v56, %v3822_v36 }
 0x9cf   : > { %3855 = vst.msk [vmem:[#allocation2] sm:$0xff] %vm1088_vm3, %v3853_v58  ;;  %v3846_v60 = vmul.f32 %v4338_v46, %v3838_v59  ;;  %3860 = sbr.rel (%p4340_p5) target bundleno = 2721 (0xaa1), region = 124 }
 0x9d1   : > { %v3854_v61 = vadd.f32 %v4339_v55, %v3846_v60 }
 0x9d3   : > { %3856 = vst.msk [vmem:[#allocation2 + $0x8] sm:$0xff] %vm1088_vm3, %v3854_v61 }
 0x9d4   : > { %v4811_v62 = vmov 0.0   ;;  %vm4812_vm4 = vmmov 0   ;;  %v3862_v1 = vld [vmem:[#allocation3] sm:$0x1]  ;;  %v4813_v20 = vmov 0   ;;  %vm3951_vm5 = vcmask 122880  }
 0x9d5   : > { %4630 = vmatprep.subr.mxu0 %v4811_v62  ;;  %4634 = vmatprep.mubr.msk.f32.mxu0 %vm4812_vm4, %v4811_v62  ;;  %v3861_v63 = vld [vmem:[%s5531_s10] sm:$0x1] }
 0x9d6   : > { %4631 = vmatpush3.xpose.msk.msra.mxu0 %vm1088_vm3, %v3854_v61  ;;  %4801 = vset.pattern.permute.xlu0 %v4813_v20 }
 0x9d7   : > { %4632 = vmatprep.subr.mxu0 %v4811_v62  ;;  %3865 = vperm.xlu0 %4801, %v3862_v1  }
 0x9da   : > { %4633 = vmatpush3.xpose.msk.msra.mxu0 %vm1088_vm3, %v3853_v58 }
 0x9dd   : > { %4635 = vmatmul.mubr.msk.f32.vlgmr.msra.gmra.mxu0 %vm1088_vm3, %v3861_v63 }
 0xa52   : > { %v3866_v4 = vpop.permute.xlu0 %3865 }
 0xa53   : > { %v3871_v5 = vrot.slane %v3866_v4, %v5227_v16 }
 0xa9d   : > { %v3947_v14 = vpop.f32.mrf.mxu0 }
 0xa9e   : > { %v3948_v6 = vadd.f32 %v3947_v14, %v3871_v5 }
 0xa9f   : > { %v4636_v7 = vpop.f32.mrf.mxu0 }
 0xaa0   : > { %3952 = vst.msk [vmem:[%s5532_s26] sm:$0x1] %vm3951_vm5, %v3948_v6 }
 0xaa1 PF: > { %s5533_s12 = sld [smem:[#allocation4_spill]] }
 0xaa7   : > { %s36_s28 = sadd.s32 1, %s5533_s12  }
 0xaa8   : > { %p33_p6 = scmp.ge.s32.totalorder %s36_s28, 4  }
 0xaaa   :  { %35 = sbr.rel (!%p33_p6) target bundleno = 25 (0x19), region = 196 }

</bundles_post_ra>
